<compile_context>
chip_gen: v7x
topology: tpu7x:2x2x1
jax: 0.10.0
libtpu: 0.0.40
codegen_flags: <defaults>
</compile_context>

<pallas_src>
import functools

import jax
import jax.numpy as jnp
from jax.experimental import pallas as pl
from jax.experimental.pallas import tpu as pltpu

NODE_DIM = 32     # node_dim (PyTorch default 100, shrunk for the example)
TIME_DIM = 8      # time_enc_dim
TIME_PAD = 32     # time lanes padded so slab width K = 3*D + TIME_PAD = 128;
                  # the LAST padded lane carries a constant 1.0 (bias lane)


# ---------------------------------------------------------------------------
# kernel
# ---------------------------------------------------------------------------
def ctcp_kernel(x_ref, w_ref, wemb_ref, out_ref):
    """Fused CTCP batch update.

    x_ref   : (TB, 4D) f32  packed slab [src | dst | cas | tfeat,0..,1] (last lane = 1.0)
    w_ref   : (4D,16D) bf16 fused weight; per entity (src/dst/cas) a 4D-wide column
                            block [ (r|z) pre-act | gi_n pre-act | gh_n pre-act ] with
                            all biases folded into the constant-1 row; 4th block
                            broadcasts [b_emb | w_pred | b_pred | 0] via that row.
    wemb_ref: (D, D)   bf16 embedding readout weight
    out_ref : (TB, 4D) f32  packed [new_src | new_dst | new_cas | pred (bcast to D)]
    """
    D = wemb_ref.shape[-1]
    TB = x_ref.shape[0]
    x = x_ref[...]                                                     # f32

    # ONE MXU push: message Linear + both GRU input projections + all three h-side
    # projections + every bias (constant-1 lane) + misc broadcast vectors.
    g = jnp.dot(x.astype(jnp.bfloat16), w_ref[...],
                preferred_element_type=jnp.float32)                    # (TB, 16D) f32

    def gru_update(blk, h):
        # blk = [a_r | a_z | a_gin | a_ghn], biases already included (PyTorch GRUCell
        # gate order r,z,n):  r=sig(a_r)  z=sig(a_z)  n=tanh(a_gin + r*a_ghn)
        rz = jax.nn.sigmoid(blk[:, 0:2 * D])
        r, z = rz[:, 0:D], rz[:, D:2 * D]
        n = jnp.tanh(blk[:, 2 * D:3 * D] + r * blk[:, 3 * D:4 * D])
        return (1.0 - z) * n + z * h                                   # f32 carry

    new_src = gru_update(g[:, 0 * D:4 * D], x[:, 0:D])
    new_dst = gru_update(g[:, 4 * D:8 * D], x[:, D:2 * D])
    new_cas = gru_update(g[:, 8 * D:12 * D], x[:, 2 * D:3 * D])

    b_emb = g[:, 12 * D:13 * D]          # every row == b_emb (constant-lane broadcast)
    w_prd = g[:, 13 * D:14 * D]
    b_prd = g[:, 14 * D:14 * D + 1]

    # embedding readout + linear predictor (lane reduction -- no N=1 MXU push)
    emb = jax.nn.relu(jnp.dot(new_cas.astype(jnp.bfloat16), wemb_ref[...],
                              preferred_element_type=jnp.float32) + b_emb)
    pred = jnp.sum(emb * w_prd, axis=-1, keepdims=True) + b_prd        # (TB, 1)

    out_ref[...] = jnp.concatenate(
        [new_src, new_dst, new_cas, jnp.broadcast_to(pred, (TB, D))], axis=-1)


# ---------------------------------------------------------------------------
# pallas_call builder (cached) + tiling heuristic
# ---------------------------------------------------------------------------
@functools.lru_cache(maxsize=None)
def _build_ctcp_call(Bp, TB, D, K, N):
    grid = (Bp // TB,)
    in_specs = [
        pl.BlockSpec((TB, K), lambda i: (i, 0)),     # activation slab (batch tiled)
        pl.BlockSpec((K, N), lambda i: (0, 0)),      # fused weight (resident)
        pl.BlockSpec((D, D), lambda i: (0, 0)),      # embedding weight (resident)
    ]
    out_specs = pl.BlockSpec((TB, 4 * D), lambda i: (i, 0))
    return pl.pallas_call(
        ctcp_kernel,
        grid=grid,
        in_specs=in_specs,
        out_specs=out_specs,
        out_shape=jax.ShapeDtypeStruct((Bp, 4 * D), jnp.float32),
        compiler_params=pltpu.CompilerParams(
            dimension_semantics=("parallel",),        # megacore split for large batches
            vmem_limit_bytes=32 * 1024 * 1024),       # <= v7x scoped default; footprint ~MBs
    )


def _pick_tile(batch, max_tb=512):
    """Single grid step up to 512 rows (per-step overhead dominates tiny kernels);
    for larger batches use balanced multiple-of-8 tiles (v7x megacore friendly)."""
    bp = max(8, ((batch + 7) // 8) * 8)
    if bp <= max_tb:
        return bp, bp
    n_tiles = -(-bp // max_tb)
    tb = ((-(-bp // n_tiles) + 7) // 8) * 8
    return tb * n_tiles, tb


# ---------------------------------------------------------------------------
# batch update (gather-side glue is jitted; XLA fuses pack + cos with the gathers)
# ---------------------------------------------------------------------------
def _ctcp_batch(params, src_s, dst_s, cas_s, dt):
    B, D = src_s.shape
    K, N = params['w_all'].shape
    T = params['time_w'].shape[-1]
    tpad = K - 3 * D
    Bp, TB = _pick_tile(B)

    # 'difference' time encoder, then one lane-dense slab with a trailing 1.0 bias lane.
    tfeat = jnp.cos(dt.reshape(B, 1) * params['time_w'] + params['time_b'])   # (B, T)
    slab = jnp.concatenate(
        [src_s, dst_s, cas_s, tfeat,
         jnp.zeros((B, tpad - T - 1), jnp.float32),
         jnp.ones((B, 1), jnp.float32)], axis=-1)                             # (B, K)
    if Bp != B:
        slab = jnp.pad(slab, ((0, Bp - B), (0, 0)))

    packed = _build_ctcp_call(Bp, TB, D, K, N)(slab, params['w_all'], params['w_emb'])
    return (packed[:B, 0:D], packed[:B, D:2 * D],
            packed[:B, 2 * D:3 * D], packed[:B, 3 * D])


ctcp_batch = jax.jit(_ctcp_batch)


@jax.jit
def _forward_core(params, user_state, cas_state, src_idx, dst_idx, cas_idx, dt, target_mask):
    src_s = user_state[src_idx]
    dst_s = user_state[dst_idx]
    cas_s = cas_state[cas_idx]

    new_src, new_dst, new_cas, pred_all = _ctcp_batch(params, src_s, dst_s, cas_s, dt)

    # state_updater.update_state: scatter updated states back to the tables.
    # TODO(synk): duplicate node ids in a batch follow JAX scatter last-write-wins
    # semantics, which may differ from PyTorch's sequential in-place update order.
    new_user_state = user_state.at[src_idx].set(new_src).at[dst_idx].set(new_dst)
    new_cas_state = cas_state.at[cas_idx].set(new_cas)

    # pred = zeros(batch); pred[target_idx] = predictor(emb)
    pred = jnp.where(target_mask, pred_all, 0.0)
    return pred, new_user_state, new_cas_state


def ctcp_forward(params, user_state, cas_state, source_nodes, destination_nodes,
                 trans_cascades, edge_times, pub_times, target_idx, max_time=1.0):
    """Returns (pred, new_user_state, new_cas_state).
    TODO(synk): HGraph.insert (python dict bookkeeping) has no tensor equivalent."""
    dt = ((edge_times - pub_times) / max_time).astype(jnp.float32)
    return _forward_core(params, user_state, cas_state,
                         jnp.asarray(source_nodes), jnp.asarray(destination_nodes),
                         jnp.asarray(trans_cascades), dt, jnp.asarray(target_idx))


# ---------------------------------------------------------------------------
# parameters: "PyTorch-layout" raw params  +  packing into the fused kernel layout
# ---------------------------------------------------------------------------
def init_raw_params(key, D=NODE_DIM, T=TIME_DIM):
    ks = jax.random.split(key, 16)

    def u(k, shape, fan_in):
        b = 1.0 / float(fan_in) ** 0.5
        return jax.random.uniform(k, shape, jnp.float32, -b, b)

    return dict(
        time_w=u(ks[0], (1, T), 1), time_b=u(ks[1], (1, T), 1),
        w_msg=u(ks[2], (3 * D + T, D), 3 * D + T), b_msg=u(ks[3], (1, D), 3 * D + T),
        u_wih=u(ks[4], (D, 3 * D), D), u_whh=u(ks[5], (D, 3 * D), D),
        u_bih=u(ks[6], (1, 3 * D), D), u_bhh=u(ks[7], (1, 3 * D), D),
        c_wih=u(ks[8], (D, 3 * D), D), c_whh=u(ks[9], (D, 3 * D), D),
        c_bih=u(ks[10], (1, 3 * D), D), c_bhh=u(ks[11], (1, 3 * D), D),
        w_emb=u(ks[12], (D, D), D), b_emb=u(ks[13], (1, D), D),
        w_pred=u(ks[14], (D, 1), D), b_pred=u(ks[15], (1, 1), D),
    )


def pack_params(raw, D=NODE_DIM, T=TIME_DIM, tpad=TIME_PAD):
    """Fold message Linear + GRU projections + h-side weights + all biases into one
    (K, 16D) weight.  Folded products are computed in f32, cast to bf16 once.
    NOTE: rows 3D+T .. K-2 must stay exactly zero (padded time lanes) and row K-1 is
    the bias row keyed to the constant-1 slab lane -- preserve this when loading
    trained checkpoints."""
    K = 3 * D + tpad                                   # 128
    w_msg_aug = jnp.zeros((K, D), jnp.float32).at[:3 * D + T, :].set(raw['w_msg'])

    def entity_block(w_ih, w_hh, b_ih, b_hh, h_row0):
        gi_w = w_msg_aug @ w_ih                        # (K, 3D), f32 fold
        gi_b = (raw['b_msg'] @ w_ih + b_ih)[0]         # (3D,)
        blk = jnp.zeros((K, 4 * D), jnp.float32)
        # r,z columns: gi + gh weights, biases (ih+hh) on the constant-1 row
        blk = blk.at[:, 0:2 * D].set(gi_w[:, 0:2 * D])
        blk = blk.at[h_row0:h_row0 + D, 0:2 * D].add(w_hh[:, 0:2 * D])
        blk = blk.at[K - 1, 0:2 * D].set(gi_b[0:2 * D] + b_hh[0, 0:2 * D])
        # gi_n columns (input-side n pre-activation)
        blk = blk.at[:, 2 * D:3 * D].set(gi_w[:, 2 * D:3 * D])
        blk = blk.at[K - 1, 2 * D:3 * D].set(gi_b[2 * D:3 * D])
        # gh_n columns (h-side n pre-activation, multiplied by r in-kernel)
        blk = blk.at[h_row0:h_row0 + D, 3 * D:4 * D].set(w_hh[:, 2 * D:3 * D])
        blk = blk.at[K - 1, 3 * D:4 * D].set(b_hh[0, 2 * D:3 * D])
        return blk

    blk_src = entity_block(raw['u_wih'], raw['u_whh'], raw['u_bih'], raw['u_bhh'], 0)
    blk_dst = entity_block(raw['u_wih'], raw['u_whh'], raw['u_bih'], raw['u_bhh'], D)
    blk_cas = entity_block(raw['c_wih'], raw['c_whh'], raw['c_bih'], raw['c_bhh'], 2 * D)

    # misc block: constant-1 row broadcasts [b_emb | w_pred | b_pred | 0] to every row
    misc = jnp.zeros((K, 4 * D), jnp.float32)
    misc = misc.at[K - 1, 0:D].set(raw['b_emb'][0])
    misc = misc.at[K - 1, D:2 * D].set(raw['w_pred'][:, 0])
    misc = misc.at[K - 1, 2 * D].set(raw['b_pred'][0, 0])

    w_all = jnp.concatenate([blk_src, blk_dst, blk_cas, misc], axis=1)   # (128, 512)

    return dict(time_w=raw['time_w'], time_b=raw['time_b'],
                w_all=w_all.astype(jnp.bfloat16),
                w_emb=raw['w_emb'].astype(jnp.bfloat16))


# ---------------------------------------------------------------------------
# pure-JAX f32 reference (mirrors the PyTorch modules) for validation
# ---------------------------------------------------------------------------
def ctcp_batch_ref(raw, src_s, dst_s, cas_s, dt):
    D = src_s.shape[1]
    tfeat = jnp.cos(dt.reshape(-1, 1) * raw['time_w'] + raw['time_b'])
    xcat = jnp.concatenate([src_s, dst_s, cas_s, tfeat], axis=-1)
    msg = xcat @ raw['w_msg'] + raw['b_msg']

    def gru(x, h, w_ih, w_hh, b_ih, b_hh):
        gi = x @ w_ih + b_ih
        gh = h @ w_hh + b_hh
        r = jax.nn.sigmoid(gi[:, 0:D] + gh[:, 0:D])
        z = jax.nn.sigmoid(gi[:, D:2 * D] + gh[:, D:2 * D])
        n = jnp.tanh(gi[:, 2 * D:3 * D] + r * gh[:, 2 * D:3 * D])
        return (1.0 - z) * n + z * h

    new_src = gru(msg, src_s, raw['u_wih'], raw['u_whh'], raw['u_bih'], raw['u_bhh'])
    new_dst = gru(msg, dst_s, raw['u_wih'], raw['u_whh'], raw['u_bih'], raw['u_bhh'])
    new_cas = gru(msg, cas_s, raw['c_wih'], raw['c_whh'], raw['c_bih'], raw['c_bhh'])
    emb = jax.nn.relu(new_cas @ raw['w_emb'] + raw['b_emb'])
    pred = emb @ raw['w_pred'] + raw['b_pred']
    return new_src, new_dst, new_cas, pred[:, 0]


# ---------------------------------------------------------------------------
if __name__ == "__main__":
    key = jax.random.PRNGKey(0)
    D, T = NODE_DIM, TIME_DIM
    n_user, n_cas, B = 48, 24, 64
    max_time = 10.0

    pk, sk = jax.random.split(key)
    raw = init_raw_params(pk, D, T)
    params = pack_params(raw, D, T)

    k1, k2, k3, k4 = jax.random.split(sk, 4)
    user_state = jax.random.normal(k1, (n_user, D), jnp.float32) * 0.1
    cas_state = jax.random.normal(k2, (n_cas, D), jnp.float32) * 0.1
    source_nodes = jax.random.randint(k3, (B,), 0, n_user)
    destination_nodes = jax.random.randint(k4, (B,), 0, n_user)
    trans_cascades = jnp.arange(B, dtype=jnp.int32) % n_cas
    edge_times = jnp.linspace(1.0, 8.0, B, dtype=jnp.float32)
    pub_times = jnp.zeros((B,), jnp.float32)
    target_idx = (jnp.arange(B) % 2) == 0

    # validate the fused kernel against the f32 reference (bf16 MXU operand tolerance)
    src_s = user_state[source_nodes]
    dst_s = user_state[destination_nodes]
    cas_s = cas_state[trans_cascades]
    dt = (edge_times - pub_times) / max_time
    got = ctcp_batch(params, src_s, dst_s, cas_s, dt)
    want = ctcp_batch_ref(raw, src_s, dst_s, cas_s, dt)
    jax.block_until_ready(got)
    for g_arr, w_arr in zip(got, want):
        err = float(jnp.max(jnp.abs(g_arr - w_arr.reshape(g_arr.shape))))
        assert err < 5e-2, f"kernel deviates from f32 reference: max abs err {err}"

    pred, new_user_state, new_cas_state = ctcp_forward(
        params, user_state, cas_state, source_nodes, destination_nodes,
        trans_cascades, edge_times, pub_times, target_idx, max_time=max_time)

    jax.block_until_ready((pred, new_user_state, new_cas_state))
    assert pred.shape == (B,)
    assert new_user_state.shape == (n_user, D)
    assert new_cas_state.shape == (n_cas, D)
    assert bool(jnp.all(jnp.where(target_idx, True, pred == 0.0)))
    print("KERNEL_OK")
</pallas_src>

<mosaic_0001>
module attributes {stable_mosaic.version = 11 : i64} {
  func.func @ctcp_kernel(%arg0: i32, %arg1: memref<64x128xf32, #tpu.memory_space<vmem>>, %arg2: memref<128x512xbf16, #tpu.memory_space<vmem>>, %arg3: memref<32x32xbf16, #tpu.memory_space<vmem>>, %arg4: memref<64x128xf32, #tpu.memory_space<vmem>>) attributes {dimension_semantics = [#tpu.dimension_semantics<parallel>], iteration_bounds = array<i64: 1>, scalar_prefetch = 0 : i64, scratch_operands = 0 : i64, tpu.core_type = #tpu.core_type<tc>, window_params = [{transform_indices = @transform_0, window_bounds = array<i64: 64, 128>}, {pipeline_mode = #tpu.pipeline_mode<synchronous>, transform_indices = @transform_1, window_bounds = array<i64: 128, 512>}, {pipeline_mode = #tpu.pipeline_mode<synchronous>, transform_indices = @transform_2, window_bounds = array<i64: 32, 32>}, {transform_indices = @transform_3, window_bounds = array<i64: 64, 128>}]} {
    %c0 = arith.constant 0 : index
    %c0_0 = arith.constant 0 : index
    %0 = vector.load %arg1[%c0, %c0_0] : memref<64x128xf32, #tpu.memory_space<vmem>>, vector<64x128xf32>
    %1 = arith.truncf %0 : vector<64x128xf32> to vector<64x128xbf16>
    %c0_1 = arith.constant 0 : index
    %c0_2 = arith.constant 0 : index
    %2 = vector.load %arg2[%c0_1, %c0_2] : memref<128x512xbf16, #tpu.memory_space<vmem>>, vector<128x512xbf16>
    %cst = arith.constant dense<0.000000e+00> : vector<64x512xf32>
    %3 = tpu.matmul %1, %2, %cst {dimension_numbers = #tpu.dot_dimension_numbers<[1], [0], [0], [1], [0, 0, 1, 1], [], []>} : vector<64x128xbf16>, vector<128x512xbf16>, vector<64x512xf32> -> vector<64x512xf32>
    %4 = vector.extract_strided_slice %3 {offsets = [0, 0], sizes = [64, 128], strides = [1, 1]} : vector<64x512xf32> to vector<64x128xf32>
    %5 = vector.extract_strided_slice %0 {offsets = [0, 0], sizes = [64, 32], strides = [1, 1]} : vector<64x128xf32> to vector<64x32xf32>
    %6 = vector.extract_strided_slice %4 {offsets = [0, 0], sizes = [64, 64], strides = [1, 1]} : vector<64x128xf32> to vector<64x64xf32>
    %7 = arith.negf %6 : vector<64x64xf32>
    %8 = math.exp %7 : vector<64x64xf32>
    %cst_3 = arith.constant 1.000000e+00 : f32
    %9 = vector.broadcast %cst_3 : f32 to vector<64x64xf32>
    %10 = arith.addf %9, %8 : vector<64x64xf32>
    %11 = arith.divf %9, %10 : vector<64x64xf32>
    %12 = vector.extract_strided_slice %11 {offsets = [0, 0], sizes = [64, 32], strides = [1, 1]} : vector<64x64xf32> to vector<64x32xf32>
    %13 = vector.extract_strided_slice %11 {offsets = [0, 32], sizes = [64, 32], strides = [1, 1]} : vector<64x64xf32> to vector<64x32xf32>
    %14 = vector.extract_strided_slice %4 {offsets = [0, 64], sizes = [64, 32], strides = [1, 1]} : vector<64x128xf32> to vector<64x32xf32>
    %15 = vector.extract_strided_slice %4 {offsets = [0, 96], sizes = [64, 32], strides = [1, 1]} : vector<64x128xf32> to vector<64x32xf32>
    %16 = arith.mulf %12, %15 : vector<64x32xf32>
    %17 = arith.addf %14, %16 : vector<64x32xf32>
    %18 = math.tanh %17 : vector<64x32xf32>
    %cst_4 = arith.constant 1.000000e+00 : f32
    %19 = vector.broadcast %cst_4 : f32 to vector<64x32xf32>
    %20 = arith.subf %19, %13 : vector<64x32xf32>
    %21 = arith.mulf %20, %18 : vector<64x32xf32>
    %22 = arith.mulf %13, %5 : vector<64x32xf32>
    %23 = arith.addf %21, %22 : vector<64x32xf32>
    %24 = vector.extract_strided_slice %3 {offsets = [0, 128], sizes = [64, 128], strides = [1, 1]} : vector<64x512xf32> to vector<64x128xf32>
    %25 = vector.extract_strided_slice %0 {offsets = [0, 32], sizes = [64, 32], strides = [1, 1]} : vector<64x128xf32> to vector<64x32xf32>
    %26 = vector.extract_strided_slice %24 {offsets = [0, 0], sizes = [64, 64], strides = [1, 1]} : vector<64x128xf32> to vector<64x64xf32>
    %27 = arith.negf %26 : vector<64x64xf32>
    %28 = math.exp %27 : vector<64x64xf32>
    %cst_5 = arith.constant 1.000000e+00 : f32
    %29 = vector.broadcast %cst_5 : f32 to vector<64x64xf32>
    %30 = arith.addf %29, %28 : vector<64x64xf32>
    %31 = arith.divf %29, %30 : vector<64x64xf32>
    %32 = vector.extract_strided_slice %31 {offsets = [0, 0], sizes = [64, 32], strides = [1, 1]} : vector<64x64xf32> to vector<64x32xf32>
    %33 = vector.extract_strided_slice %31 {offsets = [0, 32], sizes = [64, 32], strides = [1, 1]} : vector<64x64xf32> to vector<64x32xf32>
    %34 = vector.extract_strided_slice %24 {offsets = [0, 64], sizes = [64, 32], strides = [1, 1]} : vector<64x128xf32> to vector<64x32xf32>
    %35 = vector.extract_strided_slice %24 {offsets = [0, 96], sizes = [64, 32], strides = [1, 1]} : vector<64x128xf32> to vector<64x32xf32>
    %36 = arith.mulf %32, %35 : vector<64x32xf32>
    %37 = arith.addf %34, %36 : vector<64x32xf32>
    %38 = math.tanh %37 : vector<64x32xf32>
    %cst_6 = arith.constant 1.000000e+00 : f32
    %39 = vector.broadcast %cst_6 : f32 to vector<64x32xf32>
    %40 = arith.subf %39, %33 : vector<64x32xf32>
    %41 = arith.mulf %40, %38 : vector<64x32xf32>
    %42 = arith.mulf %33, %25 : vector<64x32xf32>
    %43 = arith.addf %41, %42 : vector<64x32xf32>
    %44 = vector.extract_strided_slice %3 {offsets = [0, 256], sizes = [64, 128], strides = [1, 1]} : vector<64x512xf32> to vector<64x128xf32>
    %45 = vector.extract_strided_slice %0 {offsets = [0, 64], sizes = [64, 32], strides = [1, 1]} : vector<64x128xf32> to vector<64x32xf32>
    %46 = vector.extract_strided_slice %44 {offsets = [0, 0], sizes = [64, 64], strides = [1, 1]} : vector<64x128xf32> to vector<64x64xf32>
    %47 = arith.negf %46 : vector<64x64xf32>
    %48 = math.exp %47 : vector<64x64xf32>
    %cst_7 = arith.constant 1.000000e+00 : f32
    %49 = vector.broadcast %cst_7 : f32 to vector<64x64xf32>
    %50 = arith.addf %49, %48 : vector<64x64xf32>
    %51 = arith.divf %49, %50 : vector<64x64xf32>
    %52 = vector.extract_strided_slice %51 {offsets = [0, 0], sizes = [64, 32], strides = [1, 1]} : vector<64x64xf32> to vector<64x32xf32>
    %53 = vector.extract_strided_slice %51 {offsets = [0, 32], sizes = [64, 32], strides = [1, 1]} : vector<64x64xf32> to vector<64x32xf32>
    %54 = vector.extract_strided_slice %44 {offsets = [0, 64], sizes = [64, 32], strides = [1, 1]} : vector<64x128xf32> to vector<64x32xf32>
    %55 = vector.extract_strided_slice %44 {offsets = [0, 96], sizes = [64, 32], strides = [1, 1]} : vector<64x128xf32> to vector<64x32xf32>
    %56 = arith.mulf %52, %55 : vector<64x32xf32>
    %57 = arith.addf %54, %56 : vector<64x32xf32>
    %58 = math.tanh %57 : vector<64x32xf32>
    %cst_8 = arith.constant 1.000000e+00 : f32
    %59 = vector.broadcast %cst_8 : f32 to vector<64x32xf32>
    %60 = arith.subf %59, %53 : vector<64x32xf32>
    %61 = arith.mulf %60, %58 : vector<64x32xf32>
    %62 = arith.mulf %53, %45 : vector<64x32xf32>
    %63 = arith.addf %61, %62 : vector<64x32xf32>
    %64 = vector.extract_strided_slice %3 {offsets = [0, 384], sizes = [64, 32], strides = [1, 1]} : vector<64x512xf32> to vector<64x32xf32>
    %65 = vector.extract_strided_slice %3 {offsets = [0, 416], sizes = [64, 32], strides = [1, 1]} : vector<64x512xf32> to vector<64x32xf32>
    %66 = vector.extract_strided_slice %3 {offsets = [0, 448], sizes = [64, 1], strides = [1, 1]} : vector<64x512xf32> to vector<64x1xf32>
    %67 = arith.truncf %63 : vector<64x32xf32> to vector<64x32xbf16>
    %c0_9 = arith.constant 0 : index
    %c0_10 = arith.constant 0 : index
    %68 = vector.load %arg3[%c0_9, %c0_10] : memref<32x32xbf16, #tpu.memory_space<vmem>>, vector<32x32xbf16>
    %cst_11 = arith.constant dense<0.000000e+00> : vector<64x32xf32>
    %69 = tpu.matmul %67, %68, %cst_11 {dimension_numbers = #tpu.dot_dimension_numbers<[1], [0], [0], [1], [0, 0, 1, 1], [], []>} : vector<64x32xbf16>, vector<32x32xbf16>, vector<64x32xf32> -> vector<64x32xf32>
    %70 = arith.addf %69, %64 : vector<64x32xf32>
    %cst_12 = arith.constant 0.000000e+00 : f32
    %71 = vector.broadcast %cst_12 : f32 to vector<64x32xf32>
    %72 = arith.maximumf %70, %71 : vector<64x32xf32>
    %73 = arith.mulf %72, %65 : vector<64x32xf32>
    %cst_13 = arith.constant dense<0.000000e+00> : vector<64xf32>
    %74 = vector.multi_reduction <add>, %73, %cst_13 [1] : vector<64x32xf32> to vector<64xf32>
    %75 = vector.shape_cast %74 : vector<64xf32> to vector<64x1xf32>
    %76 = arith.addf %75, %66 : vector<64x1xf32>
    %77 = vector.shape_cast %76 : vector<64x1xf32> to vector<64x1xf32>
    %78 = vector.broadcast %77 : vector<64x1xf32> to vector<64x32xf32>
    %79 = tpu.concatenate %23, %43, %63, %78 in 1 : vector<64x32xf32>, vector<64x32xf32>, vector<64x32xf32>, vector<64x32xf32> -> vector<64x128xf32>
    %c0_14 = arith.constant 0 : index
    %c0_15 = arith.constant 0 : index
    %80 = vector.load %arg4[%c0_14, %c0_15] : memref<64x128xf32, #tpu.memory_space<vmem>>, vector<64x128xf32>
    tpu.vector_store %arg4[%c0_14, %c0_15], %79 {strides = array<i32>} : memref<64x128xf32, #tpu.memory_space<vmem>>, vector<64x128xf32>,
    return
  }
  func.func @transform_0(%arg0: i32) -> (i32, i32) {
    %c0_i32 = arith.constant 0 : i32
    %c0_i32_0 = arith.constant 0 : i32
    return %arg0, %c0_i32 : i32, i32
  }
  func.func @transform_1(%arg0: i32) -> (i32, i32) {
    %c0_i32 = arith.constant 0 : i32
    %c0_i32_0 = arith.constant 0 : i32
    %c0_i32_1 = arith.constant 0 : i32
    return %c0_i32, %c0_i32_0 : i32, i32
  }
  func.func @transform_2(%arg0: i32) -> (i32, i32) {
    %c0_i32 = arith.constant 0 : i32
    %c0_i32_0 = arith.constant 0 : i32
    %c0_i32_1 = arith.constant 0 : i32
    return %c0_i32, %c0_i32_0 : i32, i32
  }
  func.func @transform_3(%arg0: i32) -> (i32, i32) {
    %c0_i32 = arith.constant 0 : i32
    %c0_i32_0 = arith.constant 0 : i32
    return %arg0, %c0_i32 : i32, i32
  }
}

</mosaic_0001>

<bundles_post_ra>
// kernel: _ctcp_batch.1
= control target key start
LH: loop header
LB: loop body
LE: loop exit
PB: predicated region body
PF: predicated region fallthrough
CT: control target
= control target key end

     0   :  { %v1646_v1 = vmov 0   ;;  %s1647_s14 = smov 32   ;;  %s1649_s12 = smov 96   ;;  %vm1053_vm0 = vcmask 261120   ;;  %vm1332_vm1 = vcmask 785408   ;;  %vm1323_vm2 = vcmask 523264   ;;  %s2478_s1 = inlined_call_operand.vmem [shape: bf16[128,512], index: 1, kind: input, shape index: {}]   ;;  %s2479_s0 = inlined_call_operand.vmem [shape: f32[64,128], index: 0, kind: input, shape index: {}]   ;;  %s2480_s2 = inlined_call_operand.vmem [shape: bf16[32,32], index: 2, kind: input, shape index: {}]   ;;  %s2481_s3 = inlined_call_operand.vmem [shape: f32[64,128], index: 3, kind: output, shape index: {}]  }
   0x1   :  { %v1444_v0 = vld [vmem:[%s2478_s1 + $0xc] ss:$16 sps:$4 sm:$0xff]   ;;  %324 = vmatprep.mubr.bf16.mxu1 %v1646_v1  ;;  %251 = vmatprep.mubr.bf16.mxu0 %v1646_v1  ;;  %v1446_v2 = vld [vmem:[%s2478_s1 + $0x8] ss:$16 sps:$4 sm:$0xff]   ;;  %v1724_v17 = vld [vmem:[%s2479_s0] sm:$0xff] }
   0x2   :  { %292 = vmatprep.subr.bf16.mxu1 %v1444_v0  ;;  %v1447_v3 = vld [vmem:[%s2478_s1 + $0x2c] ss:$16 sps:$4 sm:$0xff]   ;;  %v1449_v4 = vld [vmem:[%s2478_s1 + $0x28] ss:$16 sps:$4 sm:$0xff]   ;;  %v1740_v20 = vld [vmem:[%s2479_s0 + $0x10] sm:$0xff] }
   0x3   :  { %293 = vmatpush1.bf16.msra.mxu1 %v1446_v2  ;;  %v1450_v5 = vld [vmem:[%s2478_s1 + $0x4c] ss:$16 sps:$4 sm:$0xff]   ;;  %v1452_v6 = vld [vmem:[%s2478_s1 + $0x48] ss:$16 sps:$4 sm:$0xff]   ;;  %v1756_v23 = vld [vmem:[%s2479_s0 + $0x20] sm:$0xff] }
   0x4   :  { %294 = vmatprep.subr.bf16.mxu1 %v1447_v3  ;;  %v1453_v7 = vld [vmem:[%s2478_s1 + $0x6c] ss:$16 sps:$4 sm:$0xff]   ;;  %v1455_v8 = vld [vmem:[%s2478_s1 + $0x68] ss:$16 sps:$4 sm:$0xff]   ;;  %v1772_v26 = vld [vmem:[%s2479_s0 + $0x30] sm:$0xff] }
   0x5   :  { %v1456_v9 = vld [vmem:[%s2478_s1 + $0x8c] ss:$16 sps:$4 sm:$0xff]   ;;  %v1458_v10 = vld [vmem:[%s2478_s1 + $0x88] ss:$16 sps:$4 sm:$0xff]   ;;  %v1468_v29 = vld [vmem:[%s2478_s1 + $0x4] ss:$16 sps:$4 sm:$0xff]  }
   0x6   :  { %v1459_v11 = vld [vmem:[%s2478_s1 + $0xac] ss:$16 sps:$4 sm:$0xff]   ;;  %v1461_v12 = vld [vmem:[%s2478_s1 + $0xa8] ss:$16 sps:$4 sm:$0xff]   ;;  %v1470_v30 = vld [vmem:[%s2478_s1] ss:$16 sps:$4 sm:$0xff]   ;;  %219 = vmatprep.subr.bf16.mxu0 %v1468_v29 }
   0x7   :  { %295 = vmatpush1.bf16.msra.mxu1 %v1449_v4  ;;  %v1462_v13 = vld [vmem:[%s2478_s1 + $0xcc] ss:$16 sps:$4 sm:$0xff]   ;;  %v1464_v14 = vld [vmem:[%s2478_s1 + $0xc8] ss:$16 sps:$4 sm:$0xff]   ;;  %220 = vmatpush1.bf16.msra.mxu0 %v1470_v30  ;;  %v1471_v31 = vld [vmem:[%s2478_s1 + $0x24] ss:$16 sps:$4 sm:$0xff]  }
   0x8   :  { %296 = vmatprep.subr.bf16.mxu1 %v1450_v5  ;;  %v1465_v15 = vld [vmem:[%s2478_s1 + $0xec] ss:$16 sps:$4 sm:$0xff]   ;;  %v1467_v16 = vld [vmem:[%s2478_s1 + $0xe8] ss:$16 sps:$4 sm:$0xff]   ;;  %v1473_v33 = vld [vmem:[%s2478_s1 + $0x20] ss:$16 sps:$4 sm:$0xff]   ;;  %221 = vmatprep.subr.bf16.mxu0 %v1471_v31 }
   0x9   :  { %v1729_v18 = vld [vmem:[%s2479_s0 + $0x8] sm:$0xff]  ;;  %v1745_v21 = vld [vmem:[%s2479_s0 + $0x18] sm:$0xff]  ;;  %v1474_v37 = vld [vmem:[%s2478_s1 + $0x44] ss:$16 sps:$4 sm:$0xff]  }
   0xa   :  { %v1733_v19 = vpack.c.bf16 %v1729_v18, %v1724_v17  ;;  %v1749_v22 = vpack.c.bf16 %v1745_v21, %v1740_v20  ;;  %v1761_v24 = vld [vmem:[%s2479_s0 + $0x28] sm:$0xff]  ;;  %v1777_v27 = vld [vmem:[%s2479_s0 + $0x38] sm:$0xff]  ;;  %v1476_v38 = vld [vmem:[%s2478_s1 + $0x40] ss:$16 sps:$4 sm:$0xff]  }
   0xb   :  { %297 = vmatpush1.bf16.msra.mxu1 %v1452_v6  ;;  %v1765_v25 = vpack.c.bf16 %v1761_v24, %v1756_v23  ;;  %v1781_v28 = vpack.c.bf16 %v1777_v27, %v1772_v26  ;;  %222 = vmatpush1.bf16.msra.mxu0 %v1473_v33  ;;  %v1477_v39 = vld [vmem:[%s2478_s1 + $0x64] ss:$16 sps:$4 sm:$0xff]   ;;  %v1479_v41 = vld [vmem:[%s2478_s1 + $0x60] ss:$16 sps:$4 sm:$0xff]  }
   0xc   :  { %298 = vmatprep.subr.bf16.mxu1 %v1453_v7  ;;  %223 = vmatprep.subr.bf16.mxu0 %v1474_v37  ;;  %v1480_v45 = vld [vmem:[%s2478_s1 + $0x84] ss:$16 sps:$4 sm:$0xff]   ;;  %v1482_v46 = vld [vmem:[%s2478_s1 + $0x80] ss:$16 sps:$4 sm:$0xff]  }
   0xd   :  { %v1483_v47 = vld [vmem:[%s2478_s1 + $0xa4] ss:$16 sps:$4 sm:$0xff]   ;;  %v1485_v49 = vld [vmem:[%s2478_s1 + $0xa0] ss:$16 sps:$4 sm:$0xff]  }
   0xe   :  { %v1486_v53 = vld [vmem:[%s2478_s1 + $0xc4] ss:$16 sps:$4 sm:$0xff]   ;;  %v1488_v54 = vld [vmem:[%s2478_s1 + $0xc0] ss:$16 sps:$4 sm:$0xff]  }
   0xf   :  { %299 = vmatpush1.bf16.msra.mxu1 %v1455_v8  ;;  %224 = vmatpush1.bf16.msra.mxu0 %v1476_v38  ;;  %v1489_v55 = vld [vmem:[%s2478_s1 + $0xe4] ss:$16 sps:$4 sm:$0xff]   ;;  %v1491_v57 = vld [vmem:[%s2478_s1 + $0xe0] ss:$16 sps:$4 sm:$0xff]   ;;  %s1648_s1 = smov 64  }
  0x10   :  { %300 = vmatprep.subr.bf16.mxu1 %v1456_v9  ;;  %225 = vmatprep.subr.bf16.mxu0 %v1477_v39 }
  0x13   :  { %301 = vmatpush1.bf16.msra.mxu1 %v1458_v10  ;;  %226 = vmatpush1.bf16.msra.mxu0 %v1479_v41 }
  0x14   :  { %302 = vmatprep.subr.bf16.mxu1 %v1459_v11  ;;  %227 = vmatprep.subr.bf16.mxu0 %v1480_v45 }
  0x17   :  { %303 = vmatpush1.bf16.msra.mxu1 %v1461_v12  ;;  %228 = vmatpush1.bf16.msra.mxu0 %v1482_v46 }
  0x18   :  { %304 = vmatprep.subr.bf16.mxu1 %v1462_v13  ;;  %229 = vmatprep.subr.bf16.mxu0 %v1483_v47 }
  0x1b   :  { %305 = vmatpush1.bf16.msra.mxu1 %v1464_v14  ;;  %230 = vmatpush1.bf16.msra.mxu0 %v1485_v49 }
  0x1c   :  { %306 = vmatprep.subr.bf16.mxu1 %v1465_v15  ;;  %231 = vmatprep.subr.bf16.mxu0 %v1486_v53 }
  0x1f   :  { %307 = vmatpush1.bf16.msra.mxu1 %v1467_v16  ;;  %232 = vmatpush1.bf16.msra.mxu0 %v1488_v54 }
  0x20   :  { %233 = vmatprep.subr.bf16.mxu0 %v1489_v55 }
  0x22   :  { %325 = vmatmul.mubr.bf16.vlgmr.msra.gmra.mrb[0].mxu1 %v1733_v19 }
  0x23   :  { %334 = vmatprep.mubr.bf16.mxu1 %v1646_v1  ;;  %234 = vmatpush1.bf16.msra.mxu0 %v1491_v57 }
  0x26   :  { %252 = vmatmul.mubr.bf16.vlgmr.msra.gmra.mrb[0].mxu0 %v1733_v19 }
  0x27   :  { %261 = vmatprep.mubr.bf16.mxu0 %v1646_v1 }
  0x2a   :  { %335 = vmatmul.mubr.bf16.gmra.mrb[4].mxu1 %v1749_v22 }
  0x2b   :  { %344 = vmatprep.mubr.bf16.mxu1 %v1646_v1 }
  0x2e   :  { %262 = vmatmul.mubr.bf16.gmra.mrb[4].mxu0 %v1749_v22 }
  0x2f   :  { %271 = vmatprep.mubr.bf16.mxu0 %v1646_v1 }
  0x32   :  { %345 = vmatmul.mubr.bf16.gmra.mrb[8].mxu1 %v1765_v25 }
  0x33   :  { %354 = vmatprep.mubr.bf16.mxu1 %v1646_v1 }
  0x36   :  { %272 = vmatmul.mubr.bf16.gmra.mrb[8].mxu0 %v1765_v25 }
  0x37   :  { %281 = vmatprep.mubr.bf16.mxu0 %v1646_v1 }
  0x3a   :  { %355 = vmatmul.mubr.bf16.gmra.mrb[12].mxu1 %v1781_v28 }
  0x3e   :  { %282 = vmatmul.mubr.bf16.gmra.mrb[12].mxu0 %v1781_v28 }
  0xf5   :  { %v1793_v32 = vpop.f32.mrb[0].mxu1 }
  0xf6   :  { %853 = vrot.lane.b32.xlu0 %v1793_v32, %s1647_s14  ;;  %v1800_v34 = vpop.f32.mrb[1].mxu1  ;;  %v1401_v61 = vmul.f32 -1.442695, %v1793_v32 }
  0xf7   :  { %v1802_v35 = vpop.f32.mrb[2].mxu1 }
  0xf8   :  { %v1804_v36 = vpop.f32.mrb[3].mxu1  ;;  %1494 = vpow2.f32 %v1401_v61  ;;  %v1402_v62 = vmul.f32 -1.442695, %v1802_v35 }
  0xfa   :  { %855 = vrot.lane.b32.xlu0 %v1802_v35, %s1647_s14  ;;  %1496 = vpow2.f32 %v1402_v62 }
  0xfd   :  { %v1817_v40 = vpop.f32.mrb[4].mxu1 }
  0xfe   :  { %857 = vrot.lane.b32.xlu0 %v1817_v40, %s1647_s14  ;;  %v1824_v42 = vpop.f32.mrb[5].mxu1  ;;  %v1403_v63 = vmul.f32 -1.442695, %v1817_v40 }
  0xff   :  { %v1826_v43 = vpop.f32.mrb[6].mxu1 }
 0x100   :  { %859 = vrot.lane.b32.xlu1 %v1826_v43, %s1647_s14  ;;  %v1830_v44 = vpop.f32.mrb[7].mxu1  ;;  %v1404_v0 = vmul.f32 -1.442695, %v1826_v43  ;;  %1498 = vpow2.f32 %v1403_v63 }
 0x102   :  { %v1495_v2 = vpop.eup %1494  ;;  %1500 = vpow2.f32 %v1404_v0 }
 0x103   :  { %v821_v4 = vadd.f32 1.0, %v1495_v2 }
 0x104   :  { %v1497_v5 = vpop.eup %1496 }
 0x105   :  { %v1841_v48 = vpop.f32.mrb[8].mxu1  ;;  %v822_v6 = vadd.f32 1.0, %v1497_v5 }
 0x106   :  { %861 = vrot.lane.b32.xlu1 %v1841_v48, %s1647_s14  ;;  %v1848_v50 = vpop.f32.mrb[9].mxu1  ;;  %v1405_v3 = vmul.f32 -1.442695, %v1841_v48 }
 0x107   :  { %v1850_v51 = vpop.f32.mrb[10].mxu1 }
 0x108   :  { %v1852_v52 = vpop.f32.mrb[11].mxu1  ;;  %1502 = vpow2.f32 %v1405_v3  ;;  %v1406_v1 = vmul.f32 -1.442695, %v1850_v51 }
 0x109   :  { %1504 = vrcp.f32 %v821_v4 }
 0x10a   :  { %863 = vrot.lane.b32.xlu1 %v1850_v51, %s1647_s14  ;;  %v1499_v7 = vpop.eup %1498  ;;  %1506 = vpow2.f32 %v1406_v1 }
 0x10b   :  { %1508 = vrcp.f32 %v822_v6  ;;  %v823_v10 = vadd.f32 1.0, %v1499_v7 }
 0x10c   :  { %v1501_v8 = vpop.eup %1500 }
 0x10d   :  { %v1865_v56 = vpop.f32.mrb[12].mxu1  ;;  %v824_v12 = vadd.f32 1.0, %v1501_v8 }
 0x10e   :  { %865 = vrot.lane.b32.xlu0 %v1865_v56, %s1647_s14  ;;  %v1872_v58 = vpop.f32.mrb[13].mxu1  ;;  %v1407_v9 = vmul.f32 -1.442695, %v1865_v56 }
 0x10f   :  { %v1874_v59 = vpop.f32.mrb[14].mxu1 }
 0x110   :  { %867 = vrot.lane.b32.xlu1 %v1874_v59, %s1647_s14  ;;  %v1878_v60 = vpop.f32.mrb[15].mxu1  ;;  %v1408_v11 = vmul.f32 -1.442695, %v1874_v59  ;;  %1510 = vpow2.f32 %v1407_v9 }
 0x111   :  { %1512 = vrcp.f32 %v823_v10 }
 0x112   :  { %v1503_v13 = vpop.eup %1502  ;;  %1514 = vpow2.f32 %v1408_v11 }
 0x113   :  { %v1895_v14 = vpop.eup %1504  ;;  %1516 = vrcp.f32 %v824_v12  ;;  %v825_v19 = vadd.f32 1.0, %v1503_v13 }
 0x114   :  { %v1507_v22 = vpop.eup %1506 }
 0x115   :  { %v1899_v25 = vpop.eup %1508  ;;  %1518 = vrcp.f32 %v825_v19  ;;  %v826_v30 = vadd.f32 1.0, %v1507_v22  ;;  %v1946_v19 = vpop.f32.mrb[0].mxu0 }
 0x117   :  { %1520 = vrcp.f32 %v826_v30 }
 0x11a   :  { %v1511_v31 = vpop.eup %1510 }
 0x11b   :  { %v1903_v33 = vpop.eup %1512  ;;  %v827_v45 = vadd.f32 1.0, %v1511_v31 }
 0x11c   :  { %v1515_v38 = vpop.eup %1514 }
 0x11d   :  { %v1906_v41 = vpop.eup %1516  ;;  %v828_v49 = vadd.f32 1.0, %v1515_v38  ;;  %1522 = vrcp.f32 %v827_v45 }
 0x11f   :  { %v1911_v53 = vpop.eup %1518  ;;  %1524 = vrcp.f32 %v828_v49 }
 0x121   :  { %v1915_v57 = vpop.eup %1520 }
 0x127   :  { %v1919_v63 = vpop.eup %1522 }
 0x129   :  { %v1922_v3 = vpop.eup %1524 }
 0x168   :  { %v854_v15 = vpop.permute.xlu0 %853 }
 0x169   :  { %v877_v16 = vmul.f32 %v1895_v14, %v854_v15 }
 0x16b   :  { %893 = vrot.lane.b32.xlu0 %v877_v16, %s1648_s1 }
 0x16c   :  { %v856_v28 = vpop.permute.xlu0 %855 }
 0x16d   :  { %v878_v29 = vmul.f32 %v1899_v25, %v856_v28  ;;  %v1949_v28 = vpop.f32.mrb[1].mxu0 }
 0x16f   :  { %895 = vrot.lane.b32.xlu1 %v878_v29, %s1648_s1 }
 0x170   :  { %v858_v37 = vpop.permute.xlu0 %857 }
 0x171   :  { %v879_v39 = vmul.f32 %v1903_v33, %v858_v37 }
 0x172   :  { %v860_v46 = vpop.permute.xlu1 %859 }
 0x173   :  { %v880_v47 = vmul.f32 %v1906_v41, %v860_v46  ;;  %897 = vrot.lane.b32.xlu0 %v879_v39, %s1648_s1 }
 0x175   :  { %899 = vrot.lane.b32.xlu1 %v880_v47, %s1648_s1 }
 0x178   :  { %v862_v54 = vpop.permute.xlu1 %861 }
 0x179   :  { %v881_v55 = vmul.f32 %v1911_v53, %v862_v54 }
 0x17b   :  { %901 = vrot.lane.b32.xlu0 %v881_v55, %s1648_s1 }
 0x17c   :  { %v864_v61 = vpop.permute.xlu1 %863 }
 0x17d   :  { %v882_v62 = vmul.f32 %v1915_v57, %v864_v61 }
 0x17f   :  { %903 = vrot.lane.b32.xlu1 %v882_v62, %s1648_s1 }
 0x180   :  { %v866_v0 = vpop.permute.xlu0 %865 }
 0x181   :  { %v883_v2 = vmul.f32 %v1919_v63, %v866_v0 }
 0x182   :  { %v868_v4 = vpop.permute.xlu1 %867 }
 0x183   :  { %v884_v5 = vmul.f32 %v1922_v3, %v868_v4  ;;  %905 = vrot.lane.b32.xlu0 %v883_v2, %s1648_s1 }
 0x185   :  { %907 = vrot.lane.b32.xlu1 %v884_v5, %s1648_s1  ;;  %v1492_v5 = vld [vmem:[%s2480_s2] sm:$0xff]  }
 0x186   :  { %1421 = vmatprep.subr.bf16.mxu0 %v1492_v5  ;;  %1433 = vmatprep.subr.bf16.mxu1 %v1492_v5 }
 0x187   :  { %981 = vrot.lane.b32.xlu0 %v1724_v17, %s1649_s12  ;;  %1422 = vmatpush3.bf16.msra.mxu0 %v1492_v5 }
 0x188   :  { %1435 = vmatpush3.bf16.msra.mxu1 %v1492_v5 }
 0x189   :  { %983 = vrot.lane.b32.xlu1 %v1729_v18, %s1649_s12 }
 0x18b   :  { %989 = vrot.lane.b32.xlu0 %v1756_v23, %s1649_s12 }
 0x18d   :  { %991 = vrot.lane.b32.xlu1 %v1761_v24, %s1649_s12 }
 0x18f   :  { %985 = vrot.lane.b32.xlu0 %v1740_v20, %s1649_s12 }
 0x191   :  { %987 = vrot.lane.b32.xlu1 %v1745_v21, %s1649_s12 }
 0x1dd   :  { %v894_v1 = vpop.permute.xlu0 %893 }
 0x1de   :  { %v917_v6 = vadd.f32 %v894_v1, %v1793_v32 }
 0x1e0   :  { %1526 = vtanh.f32 %v917_v6 }
 0x1e1   :  { %v896_v7 = vpop.permute.xlu1 %895 }
 0x1e2   :  { %v918_v8 = vadd.f32 %v896_v7, %v1802_v35 }
 0x1e4   :  { %1528 = vtanh.f32 %v918_v8 }
 0x1e5   :  { %v898_v9 = vpop.permute.xlu0 %897 }
 0x1e6   :  { %v919_v10 = vadd.f32 %v898_v9, %v1817_v40 }
 0x1e7   :  { %v900_v11 = vpop.permute.xlu1 %899 }
 0x1e8   :  { %1530 = vtanh.f32 %v919_v10  ;;  %v920_v12 = vadd.f32 %v900_v11, %v1826_v43  ;;  %v1952_v43 = vpop.f32.mrb[2].mxu0  ;;  %v1493_v10 = vld [vmem:[%s2480_s2 + $0x8] sm:$0xff]  }
 0x1e9   :  { %1423 = vmatprep.subr.bf16.mxu0 %v1493_v10  ;;  %1434 = vmatprep.subr.bf16.mxu1 %v1493_v10 }
 0x1ea   :  { %v1527_v13 = vpop.eup %1526  ;;  %1532 = vtanh.f32 %v920_v12  ;;  %1424 = vmatpush3.bf16.msra.mxu0 %v1493_v10  ;;  %1436 = vmatpush3.bf16.msra.mxu1 %v1493_v10 }
 0x1eb   :  { %949 = vrot.lane.b32.xlu0 %v1527_v13, %s1649_s12  ;;  %v933_v13 = vsub.f32 1.0, %v1895_v14 }
 0x1ed   :  { %v902_v15 = vpop.permute.xlu0 %901 }
 0x1ee   :  { %v1529_v16 = vpop.eup %1528  ;;  %v921_v32 = vadd.f32 %v902_v15, %v1841_v48  ;;  %v1955_v48 = vpop.f32.mrb[3].mxu0 }
 0x1ef   :  { %951 = vrot.lane.b32.xlu1 %v1529_v16, %s1649_s12  ;;  %v1958_v37 = vpop.f32.mrb[4].mxu0  ;;  %v934_v16 = vsub.f32 1.0, %v1899_v25 }
 0x1f0   :  { %1534 = vtanh.f32 %v921_v32  ;;  %v1960_v39 = vpop.f32.mrb[5].mxu0 }
 0x1f1   :  { %v904_v35 = vpop.permute.xlu1 %903  ;;  %v1963_v45 = vpop.f32.mrb[6].mxu0 }
 0x1f2   :  { %v1531_v22 = vpop.eup %1530  ;;  %v922_v40 = vadd.f32 %v904_v35, %v1850_v51  ;;  %v1965_v46 = vpop.f32.mrb[7].mxu0 }
 0x1f3   :  { %953 = vrot.lane.b32.xlu0 %v1531_v22, %s1649_s12  ;;  %v1967_v49 = vpop.f32.mrb[8].mxu0 }
 0x1f4   :  { %v1533_v29 = vpop.eup %1532  ;;  %1536 = vtanh.f32 %v922_v40  ;;  %v1970_v54 = vpop.f32.mrb[9].mxu0 }
 0x1f5   :  { %v906_v30 = vpop.permute.xlu0 %905  ;;  %955 = vrot.lane.b32.xlu1 %v1533_v29, %s1649_s12 }
 0x1f6   :  { %v923_v31 = vadd.f32 %v906_v30, %v1865_v56  ;;  %v1972_v56 = vpop.f32.mrb[10].mxu0 }
 0x1f7   :  { %v908_v38 = vpop.permute.xlu1 %907  ;;  %v1974_v55 = vpop.f32.mrb[11].mxu0 }
 0x1f8   :  { %1538 = vtanh.f32 %v923_v31  ;;  %v924_v51 = vadd.f32 %v908_v38, %v1874_v59  ;;  %v1976_v62 = vpop.f32.mrb[12].mxu0  ;;  %v935_v31 = vsub.f32 1.0, %v1903_v33 }
 0x1f9   :  { %v1985_v2 = vpop.f32.mrb[13].mxu0  ;;  %v982_v1 = vpop.permute.xlu0 %981 }
 0x1fa   :  { %v1535_v47 = vpop.eup %1534  ;;  %1540 = vtanh.f32 %v924_v51  ;;  %v1987_v4 = vpop.f32.mrb[14].mxu0  ;;  %v1005_v35 = vmul.f32 %v1895_v14, %v982_v1 }
 0x1fb   :  { %957 = vrot.lane.b32.xlu0 %v1535_v47, %s1649_s12  ;;  %v984_v6 = vpop.permute.xlu1 %983  ;;  %v936_v47 = vsub.f32 1.0, %v1906_v41 }
 0x1fc   :  { %v1006_v22 = vmul.f32 %v1899_v25, %v984_v6 }
 0x1fd   :  { %v990_v7 = vpop.permute.xlu0 %989 }
 0x1fe   :  { %v1537_v61 = vpop.eup %1536 }
 0x1ff   :  { %959 = vrot.lane.b32.xlu1 %v1537_v61, %s1649_s12  ;;  %v992_v8 = vpop.permute.xlu1 %991 }
 0x201   :  { %v986_v9 = vpop.permute.xlu0 %985 }
 0x202   :  { %v1539_v59 = vpop.eup %1538 }
 0x203   :  { %961 = vrot.lane.b32.xlu0 %v1539_v59, %s1649_s12  ;;  %v988_v11 = vpop.permute.xlu1 %987 }
 0x204   :  { %v1541_v0 = vpop.eup %1540  ;;  %v1008_v14 = vmul.f32 %v1906_v41, %v988_v11  ;;  %v1009_v41 = vmul.f32 %v1911_v53, %v990_v7  ;;  %v1010_v11 = vmul.f32 %v1915_v57, %v992_v8  ;;  %v939_v7 = vsub.f32 1.0, %v1919_v63 }
 0x205   :  { %963 = vrot.lane.b32.xlu1 %v1541_v0, %s1649_s12  ;;  %v1007_v0 = vmul.f32 %v1903_v33, %v986_v9  ;;  %v938_v33 = vsub.f32 1.0, %v1915_v57  ;;  %v940_v8 = vsub.f32 1.0, %v1922_v3 }
 0x207   :  { %993 = vrot.lane.b32.xlu0 %v1772_v26, %s1649_s12 }
 0x209   :  { %995 = vrot.lane.b32.xlu1 %v1777_v27, %s1649_s12 }
 0x25d   :  { %v950_v12 = vpop.permute.xlu0 %949 }
 0x25e   :  { %v973_v15 = vmul.f32 %v950_v12, %v933_v13  ;;  %v937_v12 = vsub.f32 1.0, %v1911_v53 }
 0x260   :  { %v1999_v29 = vadd.f32 %v1005_v35, %v973_v15  ;;  %v2027_v35 = vpop.f32.mrb[15].mxu0 }
 0x261   :  { %v952_v32 = vpop.permute.xlu1 %951 }
 0x262   :  { %v974_v40 = vmul.f32 %v952_v32, %v934_v16 }
 0x264   :  { %v2001_v30 = vadd.f32 %v1006_v22, %v974_v40 }
 0x265   :  { %v954_v38 = vpop.permute.xlu0 %953 }
 0x266   :  { %v975_v51 = vmul.f32 %v954_v38, %v935_v31  ;;  %v1021_v61 = vpack.c.bf16 %v2001_v30, %v1999_v29 }
 0x267   :  { %v956_v59 = vpop.permute.xlu1 %955 }
 0x268   :  { %v976_v25 = vmul.f32 %v956_v59, %v936_v47  ;;  %1033 = vrot.lane.b32.xlu0 %v1021_v61, %s1649_s12  ;;  %v2010_v5 = vadd.f32 %v1007_v0, %v975_v51 }
 0x26a   :  { %v2012_v1 = vadd.f32 %v1008_v14, %v976_v25  ;;  %v1389_v25 = vmul.f32 -1.442695, %v1967_v49 }
 0x26c   :  { %v1022_v6 = vpack.c.bf16 %v2012_v1, %v2010_v5 }
 0x26d   :  { %v958_v10 = vpop.permute.xlu0 %957 }
 0x26e   :  { %1035 = vrot.lane.b32.xlu0 %v1022_v6, %s1649_s12  ;;  %v977_v13 = vmul.f32 %v958_v10, %v937_v12  ;;  %v1391_v6 = vmul.f32 -1.442695, %v1976_v62 }
 0x270   :  { %v2023_v16 = vadd.f32 %v1009_v41, %v977_v13 }
 0x271   :  { %v960_v9 = vpop.permute.xlu1 %959 }
 0x272   :  { %v978_v15 = vmul.f32 %v960_v9, %v938_v33  ;;  %421 = vrot.lane.b32.xlu0 %v1946_v19, %s1647_s14  ;;  %v1386_v9 = vmul.f32 -1.442695, %v1952_v43 }
 0x274   :  { %v2025_v32 = vadd.f32 %v1010_v11, %v978_v15 }
 0x275   :  { %v962_v22 = vpop.permute.xlu0 %961 }
 0x276   :  { %425 = vrot.lane.b32.xlu0 %v1958_v37, %s1647_s14  ;;  %v1023_v40 = vpack.c.bf16 %v2025_v32, %v2023_v16  ;;  %v979_v51 = vmul.f32 %v962_v22, %v939_v7 }
 0x277   :  { %v964_v53 = vpop.permute.xlu1 %963 }
 0x278   :  { %1037 = vrot.lane.b32.xlu1 %v1023_v40, %s1649_s12  ;;  %v980_v47 = vmul.f32 %v964_v53, %v940_v8  ;;  %v1388_v40 = vmul.f32 -1.442695, %v1963_v45  ;;  %v1390_v53 = vmul.f32 -1.442695, %v1972_v56  ;;  %v1392_v8 = vmul.f32 -1.442695, %v1987_v4 }
 0x279   :  { %v994_v57 = vpop.permute.xlu0 %993 }
 0x27a   :  { %v1011_v31 = vmul.f32 %v1919_v63, %v994_v57  ;;  %429 = vrot.lane.b32.xlu0 %v1967_v49, %s1647_s14  ;;  %v1385_v63 = vmul.f32 -1.442695, %v1946_v19 }
 0x27b   :  { %v996_v38 = vpop.permute.xlu1 %995 }
 0x27c   :  { %v1012_v61 = vmul.f32 %v1922_v3, %v996_v38  ;;  %v2040_v59 = vadd.f32 %v1011_v31, %v979_v51  ;;  %1542 = vpow2.f32 %v1385_v63  ;;  %v1387_v3 = vmul.f32 -1.442695, %v1958_v37 }
 0x27e   :  { %v2042_v0 = vadd.f32 %v1012_v61, %v980_v47  ;;  %433 = vrot.lane.b32.xlu0 %v1976_v62, %s1647_s14  ;;  %1544 = vpow2.f32 %v1387_v3 }
 0x27f   :  { %1546 = vpow2.f32 %v1389_v25 }
 0x280   :  { %v1024_v14 = vpack.c.bf16 %v2042_v0, %v2040_v59  ;;  %1548 = vpow2.f32 %v1391_v6 }
 0x282   :  { %1039 = vrot.lane.b32.xlu1 %v1024_v14, %s1649_s12 }
 0x286   :  { %423 = vrot.lane.b32.xlu1 %v1952_v43, %s1647_s14  ;;  %v1543_v10 = vpop.eup %1542 }
 0x287   :  { %v389_v12 = vadd.f32 1.0, %v1543_v10 }
 0x288   :  { %v1545_v13 = vpop.eup %1544 }
 0x289   :  { %v1547_v33 = vpop.eup %1546  ;;  %1550 = vrcp.f32 %v389_v12  ;;  %v391_v41 = vadd.f32 1.0, %v1545_v13 }
 0x28a   :  { %427 = vrot.lane.b32.xlu1 %v1963_v45, %s1647_s14  ;;  %v393_v15 = vadd.f32 1.0, %v1547_v33  ;;  %v1549_v22 = vpop.eup %1548  ;;  %1552 = vpow2.f32 %v1386_v9 }
 0x28b   :  { %1554 = vrcp.f32 %v391_v41  ;;  %v395_v57 = vadd.f32 1.0, %v1549_v22 }
 0x28c   :  { %1556 = vrcp.f32 %v393_v15 }
 0x28d   :  { %1558 = vpow2.f32 %v1388_v40 }
 0x28e   :  { %431 = vrot.lane.b32.xlu1 %v1972_v56, %s1647_s14  ;;  %1560 = vpow2.f32 %v1390_v53 }
 0x28f   :  { %1562 = vrcp.f32 %v395_v57 }
 0x290   :  { %1564 = vpow2.f32 %v1392_v8 }
 0x292   :  { %435 = vrot.lane.b32.xlu1 %v1987_v4, %s1647_s14 }
 0x293   :  { %v2067_v31 = vpop.eup %1550 }
 0x294   :  { %v1553_v47 = vpop.eup %1552 }
 0x295   :  { %v2071_v61 = vpop.eup %1554  ;;  %v390_v25 = vadd.f32 1.0, %v1553_v47 }
 0x296   :  { %v2074_v3 = vpop.eup %1556 }
 0x297   :  { %v1559_v10 = vpop.eup %1558  ;;  %1566 = vrcp.f32 %v390_v25 }
 0x298   :  { %v1561_v13 = vpop.eup %1560  ;;  %v392_v41 = vadd.f32 1.0, %v1559_v10 }
 0x299   :  { %v2079_v9 = vpop.eup %1562 }
 0x29a   :  { %v1565_v22 = vpop.eup %1564  ;;  %1568 = vrcp.f32 %v392_v41 }
 0x29b   :  { %v396_v53 = vadd.f32 1.0, %v1565_v22 }
 0x2da   :  { %v1034_v11 = vpop.permute.xlu0 %1033 }
 0x2db   :  { %1425 = vmatprep.mubr.msk.bf16.mxu0 %vm1053_vm0, %v1034_v11  ;;  %v394_v11 = vadd.f32 1.0, %v1561_v13 }
 0x2dd   :  { %1570 = vrcp.f32 %v394_v11 }
 0x2de   :  { %1572 = vrcp.f32 %v396_v53 }
 0x2e0   :  { %v1036_v7 = vpop.permute.xlu0 %1035 }
 0x2e1   :  { %1426 = vmatmul.mubr.msk.bf16.vlgmr.msra.gmra.mrb[16].mxu0 %vm1053_vm0, %v1036_v7  ;;  %v2085_v7 = vpop.eup %1566 }
 0x2e4   :  { %v422_v38 = vpop.permute.xlu0 %421 }
 0x2e5   :  { %v445_v51 = vmul.f32 %v2067_v31, %v422_v38 }
 0x2e7   :  { %461 = vrot.lane.b32.xlu0 %v445_v51, %s1648_s1  ;;  %v2089_v51 = vpop.eup %1568 }
 0x2e8   :  { %v426_v14 = vpop.permute.xlu0 %425 }
 0x2e9   :  { %v447_v63 = vmul.f32 %v2071_v61, %v426_v14 }
 0x2ea   :  { %v1038_v6 = vpop.permute.xlu1 %1037 }
 0x2eb   :  { %1429 = vmatprep.mubr.msk.bf16.mxu1 %vm1053_vm0, %v1038_v6  ;;  %465 = vrot.lane.b32.xlu0 %v447_v63, %s1648_s1  ;;  %v2092_v63 = vpop.eup %1570 }
 0x2ec   :  { %v430_v12 = vpop.permute.xlu0 %429  ;;  %v2096_v10 = vpop.eup %1572 }
 0x2ed   :  { %v449_v33 = vmul.f32 %v2074_v3, %v430_v12 }
 0x2ef   :  { %469 = vrot.lane.b32.xlu0 %v449_v33, %s1648_s1 }
 0x2f0   :  { %v434_v15 = vpop.permute.xlu0 %433 }
 0x2f1   :  { %v451_v40 = vmul.f32 %v2079_v9, %v434_v15 }
 0x2f3   :  { %473 = vrot.lane.b32.xlu0 %v451_v40, %s1648_s1 }
 0x2f4   :  { %v1040_v57 = vpop.permute.xlu1 %1039 }
 0x2f5   :  { %1430 = vmatmul.mubr.msk.bf16.vlgmr.msra.gmra.mrb[16].mxu1 %vm1053_vm0, %v1040_v57 }
 0x2f8   :  { %v424_v8 = vpop.permute.xlu1 %423 }
 0x2f9   :  { %v446_v38 = vmul.f32 %v2085_v7, %v424_v8 }
 0x2fb   :  { %463 = vrot.lane.b32.xlu1 %v446_v38, %s1648_s1 }
 0x2fc   :  { %v428_v47 = vpop.permute.xlu1 %427 }
 0x2fd   :  { %v448_v14 = vmul.f32 %v2089_v51, %v428_v47 }
 0x2ff   :  { %467 = vrot.lane.b32.xlu1 %v448_v14, %s1648_s1 }
 0x300   :  { %v432_v25 = vpop.permute.xlu1 %431 }
 0x301   :  { %v450_v6 = vmul.f32 %v2092_v63, %v432_v25 }
 0x303   :  { %471 = vrot.lane.b32.xlu1 %v450_v6, %s1648_s1 }
 0x304   :  { %v436_v12 = vpop.permute.xlu1 %435 }
 0x305   :  { %v452_v13 = vmul.f32 %v2096_v10, %v436_v12 }
 0x307   :  { %475 = vrot.lane.b32.xlu1 %v452_v13, %s1648_s1 }
 0x359   :  { %v462_v33 = vpop.permute.xlu0 %461 }
 0x35a   :  { %v485_v41 = vadd.f32 %v462_v33, %v1946_v19 }
 0x35c   :  { %1574 = vtanh.f32 %v485_v41 }
 0x35d   :  { %v466_v11 = vpop.permute.xlu0 %465 }
 0x35e   :  { %v487_v15 = vadd.f32 %v466_v11, %v1958_v37 }
 0x360   :  { %1576 = vtanh.f32 %v487_v15 }
 0x361   :  { %v470_v38 = vpop.permute.xlu0 %469 }
 0x365   :  { %v474_v47 = vpop.permute.xlu0 %473 }
 0x366   :  { %v1575_v22 = vpop.eup %1574  ;;  %v491_v14 = vadd.f32 %v474_v47, %v1976_v62 }
 0x367   :  { %517 = vrot.lane.b32.xlu0 %v1575_v22, %s1649_s12 }
 0x36a   :  { %v1577_v40 = vpop.eup %1576 }
 0x36b   :  { %521 = vrot.lane.b32.xlu0 %v1577_v40, %s1649_s12 }
 0x36d   :  { %v464_v53 = vpop.permute.xlu1 %463 }
 0x36e   :  { %v486_v57 = vadd.f32 %v464_v53, %v1952_v43 }
 0x36f   :  { %1147 = vrot.lane.b32.xlu0 %v1800_v34, %s1649_s12 }
 0x370   :  { %1578 = vtanh.f32 %v486_v57 }
 0x371   :  { %v468_v8 = vpop.permute.xlu1 %467 }
 0x372   :  { %v488_v19 = vadd.f32 %v468_v8, %v1963_v45  ;;  %v489_v45 = vadd.f32 %v470_v38, %v1967_v49 }
 0x373   :  { %1151 = vrot.lane.b32.xlu0 %v1824_v42, %s1649_s12 }
 0x374   :  { %1580 = vtanh.f32 %v488_v19  ;;  %v1393_v19 = vmul.f32 -1.442695, %v1949_v28 }
 0x375   :  { %1582 = vtanh.f32 %v489_v45  ;;  %v472_v25 = vpop.permute.xlu1 %471 }
 0x376   :  { %1584 = vtanh.f32 %v491_v14  ;;  %v490_v6 = vadd.f32 %v472_v25, %v1972_v56 }
 0x377   :  { %1155 = vrot.lane.b32.xlu0 %v1848_v50, %s1649_s12 }
 0x378   :  { %1586 = vtanh.f32 %v490_v6 }
 0x379   :  { %v476_v12 = vpop.permute.xlu1 %475 }
 0x37a   :  { %v1579_v37 = vpop.eup %1578  ;;  %v492_v13 = vadd.f32 %v476_v12, %v1987_v4 }
 0x37b   :  { %1159 = vrot.lane.b32.xlu0 %v1872_v58, %s1649_s12  ;;  %519 = vrot.lane.b32.xlu1 %v1579_v37, %s1649_s12 }
 0x37c   :  { %1588 = vtanh.f32 %v492_v13  ;;  %v1395_v13 = vmul.f32 -1.442695, %v1960_v39 }
 0x37d   :  { %1590 = vpow2.f32 %v1393_v19 }
 0x37e   :  { %v1581_v43 = vpop.eup %1580 }
 0x37f   :  { %653 = vrot.lane.b32.xlu0 %v1949_v28, %s1647_s14  ;;  %523 = vrot.lane.b32.xlu1 %v1581_v43, %s1649_s12  ;;  %v1583_v49 = vpop.eup %1582 }
 0x380   :  { %v1585_v62 = vpop.eup %1584 }
 0x383   :  { %657 = vrot.lane.b32.xlu0 %v1960_v39, %s1647_s14  ;;  %1149 = vrot.lane.b32.xlu1 %v1804_v36, %s1649_s12 }
 0x387   :  { %661 = vrot.lane.b32.xlu0 %v1970_v54, %s1647_s14  ;;  %1153 = vrot.lane.b32.xlu1 %v1830_v44, %s1649_s12 }
 0x38b   :  { %665 = vrot.lane.b32.xlu0 %v1985_v2, %s1647_s14  ;;  %1157 = vrot.lane.b32.xlu1 %v1852_v52, %s1649_s12 }
 0x38f   :  { %525 = vrot.lane.b32.xlu0 %v1583_v49, %s1649_s12  ;;  %1161 = vrot.lane.b32.xlu1 %v1878_v60, %s1649_s12 }
 0x393   :  { %529 = vrot.lane.b32.xlu0 %v1585_v62, %s1649_s12  ;;  %655 = vrot.lane.b32.xlu1 %v1955_v48, %s1647_s14  ;;  %v1394_v62 = vmul.f32 -1.442695, %v1955_v48 }
 0x397   :  { %557 = vrot.lane.b32.xlu0 %v1724_v17, %s1647_s14  ;;  %659 = vrot.lane.b32.xlu1 %v1965_v46, %s1647_s14  ;;  %v1587_v17 = vpop.eup %1586 }
 0x398   :  { %v1589_v56 = vpop.eup %1588 }
 0x399   :  { %v1591_v38 = vpop.eup %1590 }
 0x39a   :  { %v621_v14 = vadd.f32 1.0, %v1591_v38 }
 0x39b   :  { %561 = vrot.lane.b32.xlu0 %v1740_v20, %s1647_s14  ;;  %663 = vrot.lane.b32.xlu1 %v1974_v55, %s1647_s14 }
 0x39c   :  { %1592 = vrcp.f32 %v621_v14  ;;  %v1400_v14 = vmul.f32 -1.442695, %v2027_v35 }
 0x39d   :  { %1594 = vpow2.f32 %v1394_v62 }
 0x39e   :  { %1596 = vpow2.f32 %v1395_v13 }
 0x39f   :  { %565 = vrot.lane.b32.xlu0 %v1756_v23, %s1647_s14  ;;  %667 = vrot.lane.b32.xlu1 %v2027_v35, %s1647_s14 }
 0x3a3   :  { %569 = vrot.lane.b32.xlu0 %v1772_v26, %s1647_s14  ;;  %527 = vrot.lane.b32.xlu1 %v1587_v17, %s1649_s12 }
 0x3a7   :  { %531 = vrot.lane.b32.xlu1 %v1589_v56, %s1649_s12  ;;  %v1396_v56 = vmul.f32 -1.442695, %v1965_v46 }
 0x3a9   :  { %1598 = vpow2.f32 %v1396_v56 }
 0x3ab   :  { %559 = vrot.lane.b32.xlu1 %v1729_v18, %s1647_s14 }
 0x3af   :  { %563 = vrot.lane.b32.xlu1 %v1745_v21, %s1647_s14 }
 0x3b3   :  { %567 = vrot.lane.b32.xlu1 %v1761_v24, %s1647_s14 }
 0x3b4   :  { %v1427_v20 = vpop.f32.mrb[16].mxu0 }
 0x3b5   :  { %v1109_v23 = vadd.f32 %v1427_v20, %v1824_v42  ;;  %v1100_v4 = vpop.f32.mrb[17].mxu0 }
 0x3b6   :  { %v1101_v26 = vadd.f32 %v1100_v4, %v1800_v34  ;;  %v1428_v33 = vpop.f32.mrb[18].mxu0 }
 0x3b7   :  { %v2166_v41 = vadd.f32 %v1428_v33, %v1830_v44  ;;  %571 = vrot.lane.b32.xlu1 %v1777_v27, %s1647_s14  ;;  %v1103_v18 = vpop.f32.mrb[19].mxu0  ;;  %v1133_v49 = vmax.f32 %v1109_v23, 0.0 }
 0x3b8   :  { %v1104_v11 = vadd.f32 %v1103_v18, %v1804_v36  ;;  %v1131_v43 = vmax.f32 %v1101_v26, 0.0  ;;  %v1397_v26 = vmul.f32 -1.442695, %v1970_v54  ;;  %v1399_v18 = vmul.f32 -1.442695, %v1985_v2 }
 0x3b9   :  { %v1134_v13 = vmax.f32 %v2166_v41, 0.0 }
 0x3ba   :  { %1600 = vpow2.f32 %v1397_v26  ;;  %v1132_v38 = vmax.f32 %v1104_v11, 0.0 }
 0x3bb   :  { %1602 = vpow2.f32 %v1399_v18 }
 0x3c8   :  { %v1431_v21 = vpop.f32.mrb[16].mxu1 }
 0x3c9   :  { %v1125_v15 = vadd.f32 %v1431_v21, %v1872_v58  ;;  %v1116_v24 = vpop.f32.mrb[17].mxu1 }
 0x3ca   :  { %v1117_v22 = vadd.f32 %v1116_v24, %v1848_v50  ;;  %v1432_v40 = vpop.f32.mrb[18].mxu1  ;;  %v2199_v24 = vpop.eup %1592 }
 0x3cb   :  { %v2174_v53 = vadd.f32 %v1432_v40, %v1878_v60  ;;  %v1119_v57 = vpop.f32.mrb[19].mxu1  ;;  %v1137_v4 = vmax.f32 %v1125_v15, 0.0  ;;  %2488 = vst [vmem:[#allocation2_spill] sm:$0xff] %v2199_v24  ;;  %v1595_v19 = vpop.eup %1594 }
 0x3cc   :  { %v2177_v8 = vadd.f32 %v1119_v57, %v1852_v52  ;;  %v1135_v12 = vmax.f32 %v1117_v22, 0.0  ;;  %v1398_v57 = vmul.f32 -1.442695, %v1974_v55  ;;  %v622_v62 = vadd.f32 1.0, %v1595_v19 }
 0x3ce   :  { %1604 = vpow2.f32 %v1398_v57 }
 0x3cf   :  { %1606 = vpow2.f32 %v1400_v14 }
 0x3d0   :  { %1608 = vrcp.f32 %v622_v62 }
 0x3d9   :  { %v2180_v27 = vpop.permute.xlu0 %517 }
 0x3dd   :  { %v2182_v37 = vpop.permute.xlu0 %521 }
 0x3e1   :  { %v1148_v45 = vpop.permute.xlu0 %1147 }
 0x3e2   :  { %v2184_v47 = vmul.f32 %v1148_v45, %v1131_v43 }
 0x3e5   :  { %v1152_v25 = vpop.permute.xlu0 %1151 }
 0x3e6   :  { %v2187_v6 = vmul.f32 %v1152_v25, %v1133_v49  ;;  %v1597_v25 = vpop.eup %1596 }
 0x3e9   :  { %v1156_v17 = vpop.permute.xlu0 %1155 }
 0x3ea   :  { %v2191_v20 = vmul.f32 %v1156_v17, %v1135_v12  ;;  %v1599_v12 = vpop.eup %1598 }
 0x3eb   :  { %v1601_v11 = vpop.eup %1600 }
 0x3ec   :  { %v1603_v18 = vpop.eup %1602 }
 0x3ed   :  { %v1160_v23 = vpop.permute.xlu0 %1159  ;;  %v2194_v33 = vpop.permute.xlu1 %519  ;;  %v627_v41 = vadd.f32 1.0, %v1603_v18 }
 0x3ee   :  { %v2197_v21 = vmul.f32 %v1160_v23, %v1137_v4  ;;  %v623_v4 = vadd.f32 1.0, %v1597_v25  ;;  %v624_v23 = vadd.f32 1.0, %v1599_v12  ;;  %v1138_v25 = vmax.f32 %v2174_v53, 0.0 }
 0x3ef   :  { %v501_v53 = vsub.f32 1.0, %v2067_v31 }
 0x3f0   :  { %1610 = vrcp.f32 %v623_v4 }
 0x3f1   :  { %v654_v22 = vpop.permute.xlu0 %653  ;;  %v2201_v40 = vpop.permute.xlu1 %523  ;;  %1612 = vrcp.f32 %v624_v23 }
 0x3f2   :  { %v677_v15 = vmul.f32 %v2199_v24, %v654_v22  ;;  %v1136_v22 = vmax.f32 %v2177_v8, 0.0 }
 0x3f4   :  { %693 = vrot.lane.b32.xlu0 %v677_v15, %s1648_s1 }
 0x3f5   :  { %v658_v43 = vpop.permute.xlu0 %657  ;;  %v1150_v45 = vpop.permute.xlu1 %1149 }
 0x3f6   :  { %v2207_v49 = vmul.f32 %v1150_v45, %v1132_v38  ;;  %v625_v38 = vadd.f32 1.0, %v1601_v11  ;;  %v1605_v45 = vpop.eup %1604 }
 0x3f7   :  { %v626_v62 = vadd.f32 1.0, %v1605_v45  ;;  %v1607_v12 = vpop.eup %1606 }
 0x3f8   :  { %1614 = vrcp.f32 %v625_v38  ;;  %v2218_v8 = vpop.eup %1608  ;;  %v628_v23 = vadd.f32 1.0, %v1607_v12  ;;  %v503_v12 = vsub.f32 1.0, %v2071_v61 }
 0x3f9   :  { %v662_v17 = vpop.permute.xlu0 %661  ;;  %v1154_v56 = vpop.permute.xlu1 %1153  ;;  %1616 = vrcp.f32 %v627_v41  ;;  %v541_v41 = vmul.f32 %v2180_v27, %v501_v53 }
 0x3fa   :  { %v2210_v26 = vmul.f32 %v1154_v56, %v1134_v13  ;;  %1618 = vrcp.f32 %v626_v62  ;;  %v2223_v18 = vpop.eup %1610 }
 0x3fb   :  { %v679_v45 = vmul.f32 %v2223_v18, %v658_v43  ;;  %1620 = vrcp.f32 %v628_v23  ;;  %v543_v43 = vmul.f32 %v2182_v37, %v503_v12 }
 0x3fd   :  { %v666_v57 = vpop.permute.xlu0 %665  ;;  %v1158_v15 = vpop.permute.xlu1 %1157 }
 0x3fe   :  { %v2213_v19 = vmul.f32 %v1158_v15, %v1136_v22  ;;  %v2227_v22 = vpop.eup %1612 }
 0x3ff   :  { %2489 = vst [vmem:[#allocation3_spill] sm:$0xff] %v2227_v22 }
 0x401   :  { %v526_v14 = vpop.permute.xlu0 %525  ;;  %v1162_v13 = vpop.permute.xlu1 %1161 }
 0x402   :  { %v2216_v56 = vmul.f32 %v1162_v13, %v1138_v25  ;;  %v2233_v62 = vpop.eup %1614 }
 0x405   :  { %v2220_v24 = vpop.permute.xlu0 %529  ;;  %v656_v4 = vpop.permute.xlu1 %655 }
 0x406   :  { %v678_v11 = vmul.f32 %v2218_v8, %v656_v4 }
 0x408   :  { %695 = vrot.lane.b32.xlu1 %v678_v11, %s1648_s1  ;;  %v2240_v11 = vpop.eup %1616 }
 0x409   :  { %v558_v15 = vpop.permute.xlu0 %557  ;;  %v660_v38 = vpop.permute.xlu1 %659  ;;  %v683_v23 = vmul.f32 %v2240_v11, %v666_v57 }
 0x40a   :  { %v581_v25 = vmul.f32 %v2067_v31, %v558_v15  ;;  %v680_v13 = vmul.f32 %v2227_v22, %v660_v38  ;;  %v681_v31 = vmul.f32 %v2233_v62, %v662_v17  ;;  %v505_v38 = vsub.f32 1.0, %v2074_v3 }
 0x40c   :  { %v2236_v4 = vadd.f32 %v581_v25, %v541_v41  ;;  %699 = vrot.lane.b32.xlu0 %v680_v13, %s1648_s1  ;;  %697 = vrot.lane.b32.xlu1 %v679_v45, %s1648_s1  ;;  %v2251_v45 = vpop.eup %1618  ;;  %v545_v22 = vmul.f32 %v526_v14, %v505_v38 }
 0x40d   :  { %v562_v27 = vpop.permute.xlu0 %561  ;;  %v664_v53 = vpop.permute.xlu1 %663 }
 0x40e   :  { %v583_v15 = vmul.f32 %v2071_v61, %v562_v27  ;;  %v682_v37 = vmul.f32 %v2251_v45, %v664_v53  ;;  %v2258_v61 = vpop.eup %1620 }
 0x40f   :  { %2490 = vst [vmem:[#allocation4_spill] sm:$0xff] %v2258_v61 }
 0x410   :  { %v2247_v41 = vadd.f32 %v583_v15, %v543_v43  ;;  %705 = vrot.lane.b32.xlu0 %v683_v23, %s1648_s1  ;;  %701 = vrot.lane.b32.xlu1 %v681_v31, %s1648_s1  ;;  %v502_v31 = vsub.f32 1.0, %v2085_v7 }
 0x411   :  { %v566_v25 = vpop.permute.xlu0 %565  ;;  %v668_v13 = vpop.permute.xlu1 %667 }
 0x412   :  { %v585_v17 = vmul.f32 %v2074_v3, %v566_v25  ;;  %v684_v27 = vmul.f32 %v2258_v61, %v668_v13  ;;  %v542_v53 = vmul.f32 %v2194_v33, %v502_v31  ;;  %v506_v13 = vsub.f32 1.0, %v2092_v63 }
 0x414   :  { %v2255_v57 = vadd.f32 %v585_v17, %v545_v22  ;;  %703 = vrot.lane.b32.xlu1 %v682_v37, %s1648_s1  ;;  %v504_v22 = vsub.f32 1.0, %v2089_v51 }
 0x415   :  { %v528_v12 = vpop.permute.xlu1 %527 }
 0x416   :  { %v544_v38 = vmul.f32 %v2201_v40, %v504_v22 }
 0x418   :  { %707 = vrot.lane.b32.xlu1 %v684_v27, %s1648_s1  ;;  %v546_v27 = vmul.f32 %v528_v12, %v506_v13 }
 0x419   :  { %v2262_v43 = vpop.permute.xlu1 %531 }
 0x41d   :  { %v560_v14 = vpop.permute.xlu1 %559 }
 0x41e   :  { %v582_v3 = vmul.f32 %v2085_v7, %v560_v14  ;;  %v2278_v7 = vpop.permute.xlu0 %569 }
 0x420   :  { %v2268_v23 = vadd.f32 %v582_v3, %v542_v53 }
 0x421   :  { %v564_v15 = vpop.permute.xlu1 %563 }
 0x422   :  { %v584_v25 = vmul.f32 %v2089_v51, %v564_v15 }
 0x424   :  { %v2273_v37 = vadd.f32 %v584_v25, %v544_v38 }
 0x425   :  { %v568_v17 = vpop.permute.xlu1 %567 }
 0x426   :  { %v586_v61 = vmul.f32 %v2092_v63, %v568_v17 }
 0x428   :  { %v2276_v33 = vadd.f32 %v586_v61, %v546_v27  ;;  %v1188_v27 = vsel %vm1053_vm0, %v2210_v26, 0.0  ;;  %v1191_v26 = vsel %vm1053_vm0, %v2191_v20, 0.0 }
 0x429   :  { %v2282_v51 = vpop.permute.xlu1 %571 }
 0x466   :  { %v694_v31 = vpop.permute.xlu0 %693 }
 0x467   :  { %v717_v14 = vadd.f32 %v694_v31, %v1949_v28  ;;  %v1182_v31 = vsel %vm1053_vm0, %v2207_v49, 0.0 }
 0x469   :  { %1622 = vtanh.f32 %v717_v14  ;;  %v1200_v14 = vsel %vm1053_vm0, %v2216_v56, 0.0 }
 0x473   :  { %v1623_v53 = vpop.eup %1622 }
 0x474   :  { %749 = vrot.lane.b32.xlu0 %v1623_v53, %s1649_s12  ;;  %v1197_v53 = vsel %vm1053_vm0, %v2197_v21, 0.0 }
 0x47a   :  { %v696_v40 = vpop.permute.xlu1 %695 }
 0x47b   :  { %v718_v3 = vadd.f32 %v696_v40, %v1955_v48  ;;  %v1650_v40 = vmov 64  }
 0x47c   :  { %1442 = vset.pattern.permute.xlu1 %v1650_v40  ;;  %1443 = vset.pattern.permute.xlu0 %v1650_v40  ;;  %v734_v40 = vsub.f32 1.0, %v2218_v8 }
 0x47d   :  { %1624 = vtanh.f32 %v718_v3 }
 0x47e   :  { %v700_v12 = vpop.permute.xlu0 %699  ;;  %v698_v22 = vpop.permute.xlu1 %697 }
 0x47f   :  { %v720_v63 = vadd.f32 %v700_v12, %v1965_v46  ;;  %v719_v61 = vadd.f32 %v698_v22, %v1960_v39 }
 0x481   :  { %1626 = vtanh.f32 %v720_v63 }
 0x482   :  { %1628 = vtanh.f32 %v719_v61  ;;  %v702_v15 = vpop.permute.xlu1 %701  ;;  %v706_v56 = vpop.permute.xlu0 %705 }
 0x483   :  { %v721_v28 = vadd.f32 %v702_v15, %v1970_v54  ;;  %v1185_v54 = vsel %vm1053_vm0, %v2187_v6, 0.0  ;;  %v723_v21 = vadd.f32 %v706_v56, %v1985_v2  ;;  %v587_v2 = vmul.f32 %v2079_v9, %v2278_v7 }
 0x485   :  { %1630 = vtanh.f32 %v721_v28 }
 0x486   :  { %v704_v38 = vpop.permute.xlu1 %703 }
 0x487   :  { %v1625_v25 = vpop.eup %1624  ;;  %v722_v13 = vadd.f32 %v704_v38, %v1974_v55  ;;  %v1179_v55 = vsel %vm1053_vm0, %v2184_v47, 0.0  ;;  %v1194_v47 = vsel %vm1053_vm0, %v2213_v19, 0.0 }
 0x488   :  { %751 = vrot.lane.b32.xlu1 %v1625_v25, %s1649_s12 }
 0x489   :  { %1632 = vtanh.f32 %v722_v13 }
 0x48a   :  { %v708_v6 = vpop.permute.xlu1 %707 }
 0x48b   :  { %v1627_v48 = vpop.eup %1626  ;;  %v724_v49 = vadd.f32 %v708_v6, %v2027_v35  ;;  %v507_v35 = vsub.f32 1.0, %v2079_v9 }
 0x48c   :  { %v1629_v17 = vpop.eup %1628  ;;  %755 = vrot.lane.b32.xlu1 %v1627_v48, %s1649_s12 }
 0x48d   :  { %753 = vrot.lane.b32.xlu0 %v1629_v17, %s1649_s12  ;;  %1634 = vtanh.f32 %v724_v49  ;;  %v547_v20 = vmul.f32 %v2220_v24, %v507_v35  ;;  %v2492_v49 = vld [vmem:[#allocation3_spill] sm:$0xff] }
 0x48e   :  { %1636 = vtanh.f32 %v723_v21  ;;  %v736_v56 = vsub.f32 1.0, %v2492_v49 }
 0x48f   :  { %v1631_v39 = vpop.eup %1630  ;;  %v595_v19 = vadd.f32 %v587_v2, %v547_v20 }
 0x491   :  { %757 = vrot.lane.b32.xlu0 %v1631_v39, %s1649_s12  ;;  %v735_v39 = vsub.f32 1.0, %v2223_v18 }
 0x493   :  { %v1633_v46 = vpop.eup %1632 }
 0x494   :  { %759 = vrot.lane.b32.xlu1 %v1633_v46, %s1649_s12 }
 0x497   :  { %v1635_v3 = vpop.eup %1634 }
 0x498   :  { %v1637_v12 = vpop.eup %1636 }
 0x4b0   :  { %1186 = vadd.xlane.f32.xlu0 %v1185_v54  ;;  %v2491_v54 = vld [vmem:[#allocation2_spill] sm:$0xff] }
 0x4b4   :  { %1180 = vadd.xlane.f32.xlu0 %v1179_v55  ;;  %v733_v55 = vsub.f32 1.0, %v2491_v54 }
 0x4b8   :  { %1189 = vadd.xlane.f32.xlu0 %v1188_v27  ;;  %1183 = vadd.xlane.f32.xlu1 %v1182_v31  ;;  %v1638_v27 = vld [vmem:[%s2479_s0 + $0x10] sm:$0xff] }
 0x4b9   :  { %v783_v31 = vmul.f32 %v1638_v27, %v2223_v18  ;;  %v1644_v27 = vld [vmem:[%s2479_s0 + $0x30] sm:$0xff] }
 0x4bc   :  { %1201 = vadd.xlane.f32.xlu0 %v1200_v14  ;;  %1198 = vadd.xlane.f32.xlu1 %v1197_v53 }
 0x4c0   :  { %1195 = vadd.xlane.f32.xlu0 %v1194_v47  ;;  %1192 = vadd.xlane.f32.xlu1 %v1191_v26  ;;  %v1639_v47 = vld [vmem:[%s2479_s0] sm:$0xff] }
 0x4c1   :  { %v781_v26 = vmul.f32 %v1639_v47, %v2491_v54 }
 0x4d1   :  { %763 = vrot.lane.b32.xlu1 %v1635_v3, %s1649_s12 }
 0x4d5   :  { %1259 = vrot.lane.b32.xlu1 %v2236_v4, %s1649_s12  ;;  %v508_v4 = vsub.f32 1.0, %v2096_v10 }
 0x4d6   :  { %761 = vrot.lane.b32.xlu0 %v1637_v12, %s1649_s12 }
 0x4d9   :  { %1263 = vrot.lane.b32.xlu1 %v2247_v41, %s1649_s12  ;;  %v588_v41 = vmul.f32 %v2096_v10, %v2282_v51 }
 0x4da   :  { %1261 = vrot.lane.b32.xlu0 %v2268_v23, %s1649_s12  ;;  %v548_v23 = vmul.f32 %v2262_v43, %v508_v4  ;;  %v1640_v4 = vld [vmem:[%s2479_s0 + $0x8] sm:$0xff] }
 0x4dc   :  { %v596_v9 = vadd.f32 %v588_v41, %v548_v23  ;;  %v782_v41 = vmul.f32 %v1640_v4, %v2218_v8  ;;  %v1641_v23 = vld [vmem:[%s2479_s0 + $0x18] sm:$0xff] }
 0x4dd   :  { %1267 = vrot.lane.b32.xlu1 %v2255_v57, %s1649_s12 }
 0x4de   :  { %1265 = vrot.lane.b32.xlu0 %v2273_v37, %s1649_s12 }
 0x4e1   :  { %1271 = vrot.lane.b32.xlu1 %v595_v19, %s1649_s12 }
 0x4e2   :  { %1269 = vrot.lane.b32.xlu0 %v2276_v33, %s1649_s12 }
 0x4e5   :  { %1291 = vrot.lane.b32.xlu1 %v1999_v29, %s1647_s14 }
 0x4e6   :  { %1273 = vrot.lane.b32.xlu0 %v596_v9, %s1649_s12  ;;  %v750_v10 = vpop.permute.xlu0 %749  ;;  %v784_v9 = vmul.f32 %v1641_v23, %v2492_v49 }
 0x4e7   :  { %v773_v53 = vmul.f32 %v750_v10, %v733_v55 }
 0x4e9   :  { %1295 = vrot.lane.b32.xlu1 %v2010_v5, %s1647_s14  ;;  %v789_v35 = vadd.f32 %v781_v26, %v773_v53 }
 0x4ea   :  { %1293 = vrot.lane.b32.xlu0 %v2001_v30, %s1647_s14 }
 0x4ee   :  { %1297 = vrot.lane.b32.xlu0 %v2012_v1, %s1647_s14 }
 0x4fa   :  { %v2344_v57 = vpop.permute.xlu1 %751 }
 0x4fb   :  { %v774_v2 = vmul.f32 %v2344_v57, %v734_v40 }
 0x4fe   :  { %v2348_v37 = vpop.permute.xlu1 %755 }
 0x4ff   :  { %v754_v24 = vpop.permute.xlu0 %753  ;;  %v776_v20 = vmul.f32 %v2348_v37, %v736_v56  ;;  %v790_v37 = vadd.f32 %v782_v41, %v774_v2 }
 0x503   :  { %v2346_v43 = vpop.permute.xlu0 %757 }
 0x506   :  { %v2351_v7 = vpop.permute.xlu1 %759 }
 0x53d   :  { %v1187_v29 = vpop.xlane.xlu0 %1186 }
 0x53e   :  { %v1205_v33 = vadd.f32 %v1187_v29, %v1824_v42  ;;  %v792_v29 = vadd.f32 %v784_v9, %v776_v20 }
 0x540   :  { %1223 = vperm.xlu1 %1442, %v1205_v33  }
 0x541   :  { %v1181_v5 = vpop.xlane.xlu0 %1180 }
 0x542   :  { %v1203_v30 = vadd.f32 %v1181_v5, %v1800_v34 }
 0x544   :  { %1213 = vperm.xlu0 %1443, %v1203_v30  }
 0x545   :  { %v1190_v51 = vpop.xlane.xlu0 %1189  ;;  %v1184_v1 = vpop.xlane.xlu1 %1183 }
 0x546   :  { %v1206_v22 = vadd.f32 %v1190_v51, %v1830_v44  ;;  %v1204_v63 = vadd.f32 %v1184_v1, %v1804_v36 }
 0x548   :  { %1228 = vperm.xlu0 %1443, %v1206_v22   ;;  %1218 = vperm.xlu1 %1442, %v1204_v63  }
 0x549   :  { %v1202_v61 = vpop.xlane.xlu0 %1201  ;;  %v1199_v15 = vpop.xlane.xlu1 %1198 }
 0x54a   :  { %v1209_v28 = vadd.f32 %v1199_v15, %v1872_v58  ;;  %v1210_v34 = vadd.f32 %v1202_v61, %v1878_v60  ;;  %v738_v15 = vsub.f32 1.0, %v2251_v45 }
 0x54c   :  { %1301 = vrot.lane.b32.xlu0 %v2025_v32, %s1647_s14  ;;  %1243 = vperm.xlu1 %1442, %v1209_v28   ;;  %v737_v28 = vsub.f32 1.0, %v2233_v62 }
 0x54d   :  { %v1193_v42 = vpop.xlane.xlu1 %1192  ;;  %v1196_v25 = vpop.xlane.xlu0 %1195 }
 0x54e   :  { %v1207_v38 = vadd.f32 %v1193_v42, %v1848_v50  ;;  %v1208_v36 = vadd.f32 %v1196_v25, %v1852_v52  ;;  %v777_v25 = vmul.f32 %v2346_v43, %v737_v28 }
 0x550   :  { %1248 = vperm.xlu0 %1443, %v1210_v34   ;;  %1233 = vperm.xlu1 %1442, %v1207_v38   ;;  %v778_v38 = vmul.f32 %v2351_v7, %v738_v15 }
 0x551   :  { %v2368_v44 = vpop.permute.xlu1 %763  ;;  %v2370_v58 = vpop.permute.xlu0 %761 }
 0x554   :  { %1238 = vperm.xlu0 %1443, %v1208_v36   ;;  %1299 = vrot.lane.b32.xlu1 %v2023_v16, %s1647_s14  ;;  %v1642_v36 = vld [vmem:[%s2479_s0 + $0x28] sm:$0xff] }
 0x555   :  { %v1260_v50 = vpop.permute.xlu1 %1259  ;;  %v1262_v60 = vpop.permute.xlu0 %1261 }
 0x556   :  { %v1315_v10 = vsel %vm1053_vm0, %v1260_v50, %v789_v35  ;;  %v1316_v8 = vsel %vm1053_vm0, %v1262_v60, %v790_v37  ;;  %v786_v50 = vmul.f32 %v1642_v36, %v2251_v45  ;;  %v1643_v60 = vld [vmem:[%s2479_s0 + $0x20] sm:$0xff] }
 0x558   :  { %1305 = vrot.lane.b32.xlu0 %v2042_v0, %s1647_s14  ;;  %1303 = vrot.lane.b32.xlu1 %v2040_v59, %s1647_s14  ;;  %v775_v59 = vmul.f32 %v754_v24, %v735_v39 }
 0x559   :  { %v1264_v32 = vpop.permute.xlu1 %1263  ;;  %v1266_v13 = vpop.permute.xlu0 %1265 }
 0x55a   :  { %v791_v6 = vadd.f32 %v783_v31, %v775_v59  ;;  %v1318_v5 = vsel %vm1053_vm0, %v1266_v13, %v792_v29  ;;  %v739_v13 = vsub.f32 1.0, %v2240_v11  ;;  %v1645_v31 = vld [vmem:[%s2479_s0 + $0x38] sm:$0xff] }
 0x55c   :  { %v1317_v21 = vsel %vm1053_vm0, %v1264_v32, %v791_v6  ;;  %v785_v32 = vmul.f32 %v1643_v60, %v2233_v62  ;;  %v779_v54 = vmul.f32 %v2370_v58, %v739_v13  ;;  %v787_v62 = vmul.f32 %v1644_v27, %v2240_v11 }
 0x55d   :  { %v2372_v48 = vpop.permute.xlu1 %1267  ;;  %v2374_v52 = vpop.permute.xlu0 %1269 }
 0x55e   :  { %v793_v43 = vadd.f32 %v785_v32, %v777_v25  ;;  %v795_v26 = vadd.f32 %v787_v62, %v779_v54 }
 0x560   :  { %v1319_v58 = vsel %vm1053_vm0, %v2372_v48, %v793_v43 }
 0x561   :  { %v2376_v17 = vpop.permute.xlu1 %1271  ;;  %v2378_v16 = vpop.permute.xlu0 %1273 }
 0x562   :  { %v1321_v49 = vsel %vm1053_vm0, %v2376_v17, %v795_v26 }
 0x565   :  { %v1292_v0 = vpop.permute.xlu1 %1291  ;;  %v1294_v46 = vpop.permute.xlu0 %1293 }
 0x566   :  { %v1324_v24 = vsel %vm1323_vm2, %v1315_v10, %v1292_v0  ;;  %v1325_v30 = vsel %vm1323_vm2, %v1316_v8, %v1294_v46  ;;  %v2493_v0 = vld [vmem:[#allocation4_spill] sm:$0xff]  ;;  %v794_v46 = vadd.f32 %v786_v50, %v778_v38 }
 0x567   :  { %v740_v39 = vsub.f32 1.0, %v2493_v0 }
 0x568   :  { %v1320_v45 = vsel %vm1053_vm0, %v2374_v52, %v794_v46 }
 0x569   :  { %v1296_v14 = vpop.permute.xlu1 %1295  ;;  %v1298_v3 = vpop.permute.xlu0 %1297  ;;  %v780_v55 = vmul.f32 %v2368_v44, %v740_v39 }
 0x56a   :  { %v1326_v18 = vsel %vm1323_vm2, %v1317_v21, %v1296_v14  ;;  %v1327_v51 = vsel %vm1323_vm2, %v1318_v5, %v1298_v3  ;;  %v788_v14 = vmul.f32 %v1645_v31, %v2493_v0 }
 0x56c   :  { %v796_v40 = vadd.f32 %v788_v14, %v780_v55 }
 0x56e   :  { %v1322_v48 = vsel %vm1053_vm0, %v2378_v16, %v796_v40 }
 0x5bf   :  { %v1224_v12 = vpop.permute.xlu1 %1223 }
 0x5c0   :  { %v1335_v19 = vsel %vm1332_vm1, %v1326_v18, %v1224_v12 }
 0x5c1   :  { %1343 = vst [vmem:[%s2481_s3 + $0x10] sm:$0xff] %v1335_v19 }
 0x5c3   :  { %v1214_v57 = vpop.permute.xlu0 %1213 }
 0x5c4   :  { %v1333_v33 = vsel %vm1332_vm1, %v1324_v24, %v1214_v57 }
 0x5c5   :  { %1341 = vst [vmem:[%s2481_s3] sm:$0xff] %v1333_v33 }
 0x5c7   :  { %v1229_v1 = vpop.permute.xlu0 %1228  ;;  %v1219_v22 = vpop.permute.xlu1 %1218 }
 0x5c8   :  { %v1336_v63 = vsel %vm1332_vm1, %v1327_v51, %v1229_v1  ;;  %v1334_v61 = vsel %vm1332_vm1, %v1325_v30, %v1219_v22 }
 0x5c9   :  { %1344 = vst [vmem:[%s2481_s3 + $0x18] sm:$0xff] %v1336_v63  ;;  %1342 = vst [vmem:[%s2481_s3 + $0x8] sm:$0xff] %v1334_v61 }
 0x5cb   :  { %v1302_v42 = vpop.permute.xlu0 %1301  ;;  %v1244_v34 = vpop.permute.xlu1 %1243 }
 0x5cc   :  { %v1329_v44 = vsel %vm1323_vm2, %v1320_v45, %v1302_v42 }
 0x5cf   :  { %v1249_v59 = vpop.permute.xlu0 %1248  ;;  %v1234_v7 = vpop.permute.xlu1 %1233 }
 0x5d3   :  { %v1239_v53 = vpop.permute.xlu0 %1238  ;;  %v1300_v6 = vpop.permute.xlu1 %1299 }
 0x5d4   :  { %v1338_v52 = vsel %vm1332_vm1, %v1329_v44, %v1239_v53  ;;  %v1328_v47 = vsel %vm1323_vm2, %v1319_v58, %v1300_v6 }
 0x5d5   :  { %1346 = vst [vmem:[%s2481_s3 + $0x28] sm:$0xff] %v1338_v52  ;;  %v1337_v11 = vsel %vm1332_vm1, %v1328_v47, %v1234_v7 }
 0x5d6   :  { %1345 = vst [vmem:[%s2481_s3 + $0x20] sm:$0xff] %v1337_v11 }
 0x5d7   :  { %v1306_v56 = vpop.permute.xlu0 %1305  ;;  %v1304_v21 = vpop.permute.xlu1 %1303 }
 0x5d8   :  { %v1331_v3 = vsel %vm1323_vm2, %v1322_v48, %v1306_v56  ;;  %v1330_v18 = vsel %vm1323_vm2, %v1321_v49, %v1304_v21 }
 0x5d9   :  { %v1340_v12 = vsel %vm1332_vm1, %v1331_v3, %v1249_v59  ;;  %v1339_v35 = vsel %vm1332_vm1, %v1330_v18, %v1244_v34 }
 0x5da   :  { %1348 = vst [vmem:[%s2481_s3 + $0x38] sm:$0xff] %v1340_v12  ;;  %1347 = vst [vmem:[%s2481_s3 + $0x30] sm:$0xff] %v1339_v35 }

</bundles_post_ra>
